<compile_context>
chip_gen: v6e
topology: v6e:2x2x1
jax: 0.10.0
libtpu: 0.0.40
codegen_flags: <defaults>
</compile_context>

<pallas_src>
import jax
import jax.numpy as jnp
import numpy as np
from jax.experimental import pallas as pl
from jax.experimental.pallas import tpu as pltpu


# ----------------------------------------------------------------------------
# Fused forward kernel: stacked LSTM (layer-major, unrolled over T) + MLP.
# ----------------------------------------------------------------------------
def _make_fused_kernel(num_layers, T, Bp, H):
    """Builds the fused forward kernel for fixed (num_layers, T, Bp, H)."""
    TB = T * Bp

    def kernel(*refs):
        # refs = [x2d, (w_ih, w_hh, b) * num_layers, w1, b1, w2f, b2f, w3f, b3f,
        #         out, seq_scratch]
        x_ref = refs[0]
        lstm_refs = refs[1:1 + 3 * num_layers]
        (w1_ref, b1_ref, w2_ref, b2_ref, w3_ref, b3_ref) = refs[
            1 + 3 * num_layers:7 + 3 * num_layers]
        out_ref = refs[7 + 3 * num_layers]
        seq_ref = refs[8 + 3 * num_layers]          # VMEM scratch (TB, H) f32

        # Layer-0 activations, time-major 2D (TB, Din0), bf16 matmul operand.
        seq_in = x_ref[...].astype(jnp.bfloat16)

        h = None
        for l in range(num_layers):
            w_ih = lstm_refs[3 * l][...]            # (Din_l, 4H) bf16
            w_hh = lstm_refs[3 * l + 1][...]        # (H, 4H)     bf16
            bias = lstm_refs[3 * l + 2][...]        # (1, 4H)     f32

            # Batched input projection + bias: ONE matmul per layer, outside the
            # serial recurrence.
            gates_x = jnp.dot(seq_in, w_ih,
                              preferred_element_type=jnp.float32) + bias  # (TB, 4H)

            h = jnp.zeros((Bp, H), jnp.float32)
            c = jnp.zeros((Bp, H), jnp.float32)
            last_layer = (l == num_layers - 1)

            # Serial recurrence: only h @ w_hh + elementwise gating per timestep.
            for t in range(T):
                gates = gates_x[t * Bp:(t + 1) * Bp, :] + jnp.dot(
                    h.astype(jnp.bfloat16), w_hh,
                    preferred_element_type=jnp.float32)                   # (Bp, 4H)
                # Gate order pre-permuted at init to (i, f, o, g):
                # one sigmoid over the contiguous 3H block, one tanh on the tail.
                sig = jax.nn.sigmoid(gates[:, :3 * H])
                i = sig[:, 0 * H:1 * H]
                f = sig[:, 1 * H:2 * H]
                o = sig[:, 2 * H:3 * H]
                g = jnp.tanh(gates[:, 3 * H:4 * H])
                c = f * c + i * g
                h = o * jnp.tanh(c)
                if not last_layer:
                    seq_ref[t * Bp:(t + 1) * Bp, :] = h
            if not last_layer:
                seq_in = seq_ref[...].astype(jnp.bfloat16)                # (TB, H)

        # MLP on the top layer's last-timestep hidden state.
        # BatchNorm1d(eval) pre-folded into w2/b2 and w3/b3; Dropout = identity.
        y = jnp.maximum(
            jnp.dot(h.astype(jnp.bfloat16), w1_ref[...],
                    preferred_element_type=jnp.float32) + b1_ref[...], 0.0)
        y = jnp.maximum(
            jnp.dot(y.astype(jnp.bfloat16), w2_ref[...],
                    preferred_element_type=jnp.float32) + b2_ref[...], 0.0)
        out = jnp.dot(y.astype(jnp.bfloat16), w3_ref[...],
                      preferred_element_type=jnp.float32) + b3_ref[...]
        out_ref[...] = out.astype(out_ref.dtype)

    return kernel


def lstm_model_forward(x_btd, params):
    """x_btd: (B, T, input_dim), batch_first like the PyTorch module."""
    B, T, D = x_btd.shape
    num_layers = len(params["lstm_k"])
    H = params["lstm_k"][0]["w_hh_t"].shape[0]
    mk = params["mlp_k"]
    O = mk["w3_tf"].shape[1]

    # Pad batch to a multiple of 8: fills every vreg sublane / MXU row.
    Bp = ((B + 7) // 8) * 8
    x_pad = jnp.pad(x_btd.astype(jnp.float32), ((0, Bp - B), (0, 0), (0, 0)))
    # Host-side time-major 2D reshape (free in XLA): the kernel gets a
    # lane/sublane-friendly operand; timestep t is the contiguous rows
    # [t*Bp, (t+1)*Bp).
    x_tm = jnp.transpose(x_pad, (1, 0, 2)).reshape(T * Bp, D)

    args = [x_tm]
    for lp in params["lstm_k"]:
        args += [lp["w_ih_t"], lp["w_hh_t"], lp["b"]]
    args += [mk["w1_t"], mk["b1"], mk["w2_tf"], mk["b2f"], mk["w3_tf"], mk["b3f"]]

    out = pl.pallas_call(
        _make_fused_kernel(num_layers, T, Bp, H),
        out_shape=jax.ShapeDtypeStruct((Bp, O), jnp.float32),
        scratch_shapes=[pltpu.VMEM((T * Bp, H), jnp.float32)],
    )(*args)
    return out[:B]


# ----------------------------------------------------------------------------
# Parameter construction (nn.LSTM / nn.Linear / nn.BatchNorm1d shapes).
#   params["lstm"] / params["mlp"]   : raw f32, PyTorch gate order, un-folded BN
#                                      (used by the pure-JAX reference).
#   params["lstm_k"] / params["mlp_k"]: kernel-ready — gate columns permuted to
#                                      (i,f,o,g), weights bf16, BN(eval) folded.
# ----------------------------------------------------------------------------
def init_params(key, input_dim, hidden_dim, mlp_dim, output_dim, num_layers):
    H = hidden_dim
    params = {"lstm": [], "lstm_k": []}
    stdv = 1.0 / np.sqrt(H)
    # PyTorch packs gates as (i, f, g, o); kernel wants (i, f, o, g).
    perm = np.concatenate([np.arange(0, H), np.arange(H, 2 * H),
                           np.arange(3 * H, 4 * H), np.arange(2 * H, 3 * H)])

    for layer in range(num_layers):
        din = input_dim if layer == 0 else H
        key, k1, k2, k3, k4 = jax.random.split(key, 5)
        w_ih = jax.random.uniform(k1, (4 * H, din), jnp.float32, -stdv, stdv)
        w_hh = jax.random.uniform(k2, (4 * H, H), jnp.float32, -stdv, stdv)
        b_ih = jax.random.uniform(k3, (4 * H,), jnp.float32, -stdv, stdv)
        b_hh = jax.random.uniform(k4, (4 * H,), jnp.float32, -stdv, stdv)
        b = b_ih + b_hh
        params["lstm"].append({
            "w_ih_t": w_ih.T,                      # (din, 4H) f32, (i,f,g,o)
            "w_hh_t": w_hh.T,                      # (H, 4H)   f32
            "b": b.reshape(1, 4 * H),              # (1, 4H)   f32
        })
        params["lstm_k"].append({
            "w_ih_t": w_ih.T[:, perm].astype(jnp.bfloat16),   # (din, 4H) bf16, (i,f,o,g)
            "w_hh_t": w_hh.T[:, perm].astype(jnp.bfloat16),   # (H, 4H)   bf16
            "b": b[perm].reshape(1, 4 * H),                   # (1, 4H)   f32
        })

    def linear(k, fan_in, fan_out):
        k1, k2 = jax.random.split(k)
        bound = 1.0 / np.sqrt(fan_in)
        w = jax.random.uniform(k1, (fan_out, fan_in), jnp.float32, -bound, bound)
        b = jax.random.uniform(k2, (fan_out,), jnp.float32, -bound, bound)
        return w, b

    key, kl1, kl2, kl3, kb1, kb2 = jax.random.split(key, 6)
    w1, b1 = linear(kl1, H, mlp_dim)
    w2, b2 = linear(kl2, mlp_dim, mlp_dim)
    w3, b3 = linear(kl3, mlp_dim, output_dim)

    # Non-trivial BatchNorm1d affine params + running stats (eval mode), so the
    # BN->Linear folding path is actually validated against the reference.
    eps = 1e-5

    def bn_params(k, dim):
        k1, k2, k3, k4 = jax.random.split(k, 4)
        gamma = 1.0 + 0.1 * jax.random.normal(k1, (dim,), jnp.float32)
        beta = 0.1 * jax.random.normal(k2, (dim,), jnp.float32)
        mean = 0.1 * jax.random.normal(k3, (dim,), jnp.float32)
        var = jnp.exp(0.2 * jax.random.normal(k4, (dim,), jnp.float32))
        return gamma, beta, mean, var

    gamma1, beta1, mean1, var1 = bn_params(kb1, mlp_dim)
    gamma2, beta2, mean2, var2 = bn_params(kb2, mlp_dim)
    s1 = gamma1 / jnp.sqrt(var1 + eps); t1 = beta1 - mean1 * s1
    s2 = gamma2 / jnp.sqrt(var2 + eps); t2 = beta2 - mean2 * s2

    w1_t, w2_t, w3_t = w1.T, w2.T, w3.T
    # Fold BN(eval) into the following Linear:
    #   (r*s + t) @ Wt + b = r @ (diag(s) Wt) + (t @ Wt + b)
    w2_tf = s1[:, None] * w2_t
    b2f = (t1 @ w2_t + b2).reshape(1, -1)
    w3_tf = s2[:, None] * w3_t
    b3f = (t2 @ w3_t + b3).reshape(1, -1)

    params["mlp"] = {   # reference: un-folded, f32
        "w1_t": w1_t, "b1": b1.reshape(1, -1),
        "w2_t": w2_t, "b2": b2.reshape(1, -1),
        "w3_t": w3_t, "b3": b3.reshape(1, -1),
        "s1": s1.reshape(1, -1), "t1": t1.reshape(1, -1),
        "s2": s2.reshape(1, -1), "t2": t2.reshape(1, -1),
    }
    params["mlp_k"] = { # kernel: BN folded, bf16 matmul operands, f32 biases
        "w1_t": w1_t.astype(jnp.bfloat16), "b1": b1.reshape(1, -1),
        "w2_tf": w2_tf.astype(jnp.bfloat16), "b2f": b2f,
        "w3_tf": w3_tf.astype(jnp.bfloat16), "b3f": b3f,
    }
    return params


# ----------------------------------------------------------------------------
# Pure-JAX f32 reference (un-fused, un-folded, PyTorch gate order & semantics).
# ----------------------------------------------------------------------------
def reference_forward(x_btd, params):
    seq = jnp.transpose(x_btd, (1, 0, 2)).astype(jnp.float32)   # (T, B, D)
    T, B, _ = seq.shape
    for layer_p in params["lstm"]:
        H = layer_p["w_hh_t"].shape[0]
        h = jnp.zeros((B, H), jnp.float32)
        c = jnp.zeros((B, H), jnp.float32)
        outs = []
        for t in range(T):
            gates = seq[t] @ layer_p["w_ih_t"] + h @ layer_p["w_hh_t"] + layer_p["b"]
            i = jax.nn.sigmoid(gates[:, 0 * H:1 * H])
            f = jax.nn.sigmoid(gates[:, 1 * H:2 * H])
            g = jnp.tanh(gates[:, 2 * H:3 * H])
            o = jax.nn.sigmoid(gates[:, 3 * H:4 * H])
            c = f * c + i * g
            h = o * jnp.tanh(c)
            outs.append(h)
        seq = jnp.stack(outs, axis=0)
    m = params["mlp"]
    h = jnp.maximum(seq[-1] @ m["w1_t"] + m["b1"], 0.0) * m["s1"] + m["t1"]  # Lin+ReLU+BN(eval)
    h = jnp.maximum(h @ m["w2_t"] + m["b2"], 0.0) * m["s2"] + m["t2"]        # Lin+ReLU+BN(eval)
    return h @ m["w3_t"] + m["b3"]


if __name__ == "__main__":
    INPUT_DIM, HIDDEN_DIM, MLP_DIM, OUTPUT_DIM, NUM_LAYERS = 8, 32, 64, 4, 2
    BATCH, SEQ = 2, 8

    key = jax.random.PRNGKey(0)
    key, kx = jax.random.split(key)
    x = jax.random.normal(kx, (BATCH, SEQ, INPUT_DIM), jnp.float32)   # batch_first

    params = init_params(key, INPUT_DIM, HIDDEN_DIM, MLP_DIM, OUTPUT_DIM, NUM_LAYERS)

    out = jax.block_until_ready(lstm_model_forward(x, params))
    ref = jax.block_until_ready(reference_forward(x, params))

    assert out.shape == (BATCH, OUTPUT_DIM), out.shape
    # Kernel uses bf16 MXU operands (f32 accumulation); compare against the f32
    # reference with a correspondingly looser tolerance.
    np.testing.assert_allclose(np.asarray(out), np.asarray(ref), rtol=5e-2, atol=4e-2)

    print("KERNEL_OK")
</pallas_src>

<mosaic_0001>
module attributes {stable_mosaic.version = 11 : i64} {
  func.func @kernel(%arg0: memref<64x8xf32, #tpu.memory_space<vmem>>, %arg1: memref<8x128xbf16, #tpu.memory_space<vmem>>, %arg2: memref<32x128xbf16, #tpu.memory_space<vmem>>, %arg3: memref<1x128xf32, #tpu.memory_space<vmem>>, %arg4: memref<32x128xbf16, #tpu.memory_space<vmem>>, %arg5: memref<32x128xbf16, #tpu.memory_space<vmem>>, %arg6: memref<1x128xf32, #tpu.memory_space<vmem>>, %arg7: memref<32x64xbf16, #tpu.memory_space<vmem>>, %arg8: memref<1x64xf32, #tpu.memory_space<vmem>>, %arg9: memref<64x64xbf16, #tpu.memory_space<vmem>>, %arg10: memref<1x64xf32, #tpu.memory_space<vmem>>, %arg11: memref<64x4xbf16, #tpu.memory_space<vmem>>, %arg12: memref<1x4xf32, #tpu.memory_space<vmem>>, %arg13: memref<8x4xf32, #tpu.memory_space<vmem>>, %arg14: memref<64x32xf32, #tpu.memory_space<vmem>>) attributes {dimension_semantics = [], scalar_prefetch = 0 : i64, scratch_operands = 1 : i64, tpu.core_type = #tpu.core_type<tc>} {
    %c0 = arith.constant 0 : index
    %c0_0 = arith.constant 0 : index
    %0 = vector.load %arg0[%c0, %c0_0] : memref<64x8xf32, #tpu.memory_space<vmem>>, vector<64x8xf32>
    %1 = arith.truncf %0 : vector<64x8xf32> to vector<64x8xbf16>
    %c0_1 = arith.constant 0 : index
    %c0_2 = arith.constant 0 : index
    %2 = vector.load %arg1[%c0_1, %c0_2] : memref<8x128xbf16, #tpu.memory_space<vmem>>, vector<8x128xbf16>
    %c0_3 = arith.constant 0 : index
    %c0_4 = arith.constant 0 : index
    %3 = vector.load %arg2[%c0_3, %c0_4] : memref<32x128xbf16, #tpu.memory_space<vmem>>, vector<32x128xbf16>
    %c0_5 = arith.constant 0 : index
    %c0_6 = arith.constant 0 : index
    %4 = vector.load %arg3[%c0_5, %c0_6] : memref<1x128xf32, #tpu.memory_space<vmem>>, vector<1x128xf32>
    %cst = arith.constant dense<0.000000e+00> : vector<64x128xf32>
    %5 = tpu.matmul %1, %2, %cst {dimension_numbers = #tpu.dot_dimension_numbers<[1], [0], [0], [1], [0, 0, 1, 1], [], []>} : vector<64x8xbf16>, vector<8x128xbf16>, vector<64x128xf32> -> vector<64x128xf32>
    %6 = vector.broadcast %4 : vector<1x128xf32> to vector<64x128xf32>
    %7 = arith.addf %5, %6 : vector<64x128xf32>
    %cst_7 = arith.constant 0.000000e+00 : f32
    %8 = vector.broadcast %cst_7 : f32 to vector<8x32xf32>
    %cst_8 = arith.constant 0.000000e+00 : f32
    %9 = vector.broadcast %cst_8 : f32 to vector<8x32xf32>
    %10 = vector.extract_strided_slice %7 {offsets = [0, 0], sizes = [8, 128], strides = [1, 1]} : vector<64x128xf32> to vector<8x128xf32>
    %11 = arith.truncf %8 : vector<8x32xf32> to vector<8x32xbf16>
    %cst_9 = arith.constant dense<0.000000e+00> : vector<8x128xf32>
    %12 = tpu.matmul %11, %3, %cst_9 {dimension_numbers = #tpu.dot_dimension_numbers<[1], [0], [0], [1], [0, 0, 1, 1], [], []>} : vector<8x32xbf16>, vector<32x128xbf16>, vector<8x128xf32> -> vector<8x128xf32>
    %13 = arith.addf %10, %12 : vector<8x128xf32>
    %14 = vector.extract_strided_slice %13 {offsets = [0, 0], sizes = [8, 96], strides = [1, 1]} : vector<8x128xf32> to vector<8x96xf32>
    %15 = arith.negf %14 : vector<8x96xf32>
    %16 = math.exp %15 : vector<8x96xf32>
    %cst_10 = arith.constant 1.000000e+00 : f32
    %17 = vector.broadcast %cst_10 : f32 to vector<8x96xf32>
    %18 = arith.addf %17, %16 : vector<8x96xf32>
    %19 = arith.divf %17, %18 : vector<8x96xf32>
    %20 = vector.extract_strided_slice %19 {offsets = [0, 0], sizes = [8, 32], strides = [1, 1]} : vector<8x96xf32> to vector<8x32xf32>
    %21 = vector.extract_strided_slice %19 {offsets = [0, 32], sizes = [8, 32], strides = [1, 1]} : vector<8x96xf32> to vector<8x32xf32>
    %22 = vector.extract_strided_slice %19 {offsets = [0, 64], sizes = [8, 32], strides = [1, 1]} : vector<8x96xf32> to vector<8x32xf32>
    %23 = vector.extract_strided_slice %13 {offsets = [0, 96], sizes = [8, 32], strides = [1, 1]} : vector<8x128xf32> to vector<8x32xf32>
    %24 = math.tanh %23 : vector<8x32xf32>
    %25 = arith.mulf %21, %9 : vector<8x32xf32>
    %26 = arith.mulf %20, %24 : vector<8x32xf32>
    %27 = arith.addf %25, %26 : vector<8x32xf32>
    %28 = math.tanh %27 : vector<8x32xf32>
    %29 = arith.mulf %22, %28 : vector<8x32xf32>
    %c0_11 = arith.constant 0 : index
    %c0_12 = arith.constant 0 : index
    %30 = vector.load %arg14[%c0_11, %c0_12] : memref<64x32xf32, #tpu.memory_space<vmem>>, vector<8x32xf32>
    tpu.vector_store %arg14[%c0_11, %c0_12], %29 {strides = array<i32>} : memref<64x32xf32, #tpu.memory_space<vmem>>, vector<8x32xf32>,
    %31 = vector.extract_strided_slice %7 {offsets = [8, 0], sizes = [8, 128], strides = [1, 1]} : vector<64x128xf32> to vector<8x128xf32>
    %32 = arith.truncf %29 : vector<8x32xf32> to vector<8x32xbf16>
    %cst_13 = arith.constant dense<0.000000e+00> : vector<8x128xf32>
    %33 = tpu.matmul %32, %3, %cst_13 {dimension_numbers = #tpu.dot_dimension_numbers<[1], [0], [0], [1], [0, 0, 1, 1], [], []>} : vector<8x32xbf16>, vector<32x128xbf16>, vector<8x128xf32> -> vector<8x128xf32>
    %34 = arith.addf %31, %33 : vector<8x128xf32>
    %35 = vector.extract_strided_slice %34 {offsets = [0, 0], sizes = [8, 96], strides = [1, 1]} : vector<8x128xf32> to vector<8x96xf32>
    %36 = arith.negf %35 : vector<8x96xf32>
    %37 = math.exp %36 : vector<8x96xf32>
    %cst_14 = arith.constant 1.000000e+00 : f32
    %38 = vector.broadcast %cst_14 : f32 to vector<8x96xf32>
    %39 = arith.addf %38, %37 : vector<8x96xf32>
    %40 = arith.divf %38, %39 : vector<8x96xf32>
    %41 = vector.extract_strided_slice %40 {offsets = [0, 0], sizes = [8, 32], strides = [1, 1]} : vector<8x96xf32> to vector<8x32xf32>
    %42 = vector.extract_strided_slice %40 {offsets = [0, 32], sizes = [8, 32], strides = [1, 1]} : vector<8x96xf32> to vector<8x32xf32>
    %43 = vector.extract_strided_slice %40 {offsets = [0, 64], sizes = [8, 32], strides = [1, 1]} : vector<8x96xf32> to vector<8x32xf32>
    %44 = vector.extract_strided_slice %34 {offsets = [0, 96], sizes = [8, 32], strides = [1, 1]} : vector<8x128xf32> to vector<8x32xf32>
    %45 = math.tanh %44 : vector<8x32xf32>
    %46 = arith.mulf %42, %27 : vector<8x32xf32>
    %47 = arith.mulf %41, %45 : vector<8x32xf32>
    %48 = arith.addf %46, %47 : vector<8x32xf32>
    %49 = math.tanh %48 : vector<8x32xf32>
    %50 = arith.mulf %43, %49 : vector<8x32xf32>
    %c8 = arith.constant 8 : index
    %c0_15 = arith.constant 0 : index
    %51 = vector.load %arg14[%c8, %c0_15] : memref<64x32xf32, #tpu.memory_space<vmem>>, vector<8x32xf32>
    tpu.vector_store %arg14[%c8, %c0_15], %50 {strides = array<i32>} : memref<64x32xf32, #tpu.memory_space<vmem>>, vector<8x32xf32>,
    %52 = vector.extract_strided_slice %7 {offsets = [16, 0], sizes = [8, 128], strides = [1, 1]} : vector<64x128xf32> to vector<8x128xf32>
    %53 = arith.truncf %50 : vector<8x32xf32> to vector<8x32xbf16>
    %cst_16 = arith.constant dense<0.000000e+00> : vector<8x128xf32>
    %54 = tpu.matmul %53, %3, %cst_16 {dimension_numbers = #tpu.dot_dimension_numbers<[1], [0], [0], [1], [0, 0, 1, 1], [], []>} : vector<8x32xbf16>, vector<32x128xbf16>, vector<8x128xf32> -> vector<8x128xf32>
    %55 = arith.addf %52, %54 : vector<8x128xf32>
    %56 = vector.extract_strided_slice %55 {offsets = [0, 0], sizes = [8, 96], strides = [1, 1]} : vector<8x128xf32> to vector<8x96xf32>
    %57 = arith.negf %56 : vector<8x96xf32>
    %58 = math.exp %57 : vector<8x96xf32>
    %cst_17 = arith.constant 1.000000e+00 : f32
    %59 = vector.broadcast %cst_17 : f32 to vector<8x96xf32>
    %60 = arith.addf %59, %58 : vector<8x96xf32>
    %61 = arith.divf %59, %60 : vector<8x96xf32>
    %62 = vector.extract_strided_slice %61 {offsets = [0, 0], sizes = [8, 32], strides = [1, 1]} : vector<8x96xf32> to vector<8x32xf32>
    %63 = vector.extract_strided_slice %61 {offsets = [0, 32], sizes = [8, 32], strides = [1, 1]} : vector<8x96xf32> to vector<8x32xf32>
    %64 = vector.extract_strided_slice %61 {offsets = [0, 64], sizes = [8, 32], strides = [1, 1]} : vector<8x96xf32> to vector<8x32xf32>
    %65 = vector.extract_strided_slice %55 {offsets = [0, 96], sizes = [8, 32], strides = [1, 1]} : vector<8x128xf32> to vector<8x32xf32>
    %66 = math.tanh %65 : vector<8x32xf32>
    %67 = arith.mulf %63, %48 : vector<8x32xf32>
    %68 = arith.mulf %62, %66 : vector<8x32xf32>
    %69 = arith.addf %67, %68 : vector<8x32xf32>
    %70 = math.tanh %69 : vector<8x32xf32>
    %71 = arith.mulf %64, %70 : vector<8x32xf32>
    %c16 = arith.constant 16 : index
    %c0_18 = arith.constant 0 : index
    %72 = vector.load %arg14[%c16, %c0_18] : memref<64x32xf32, #tpu.memory_space<vmem>>, vector<8x32xf32>
    tpu.vector_store %arg14[%c16, %c0_18], %71 {strides = array<i32>} : memref<64x32xf32, #tpu.memory_space<vmem>>, vector<8x32xf32>,
    %73 = vector.extract_strided_slice %7 {offsets = [24, 0], sizes = [8, 128], strides = [1, 1]} : vector<64x128xf32> to vector<8x128xf32>
    %74 = arith.truncf %71 : vector<8x32xf32> to vector<8x32xbf16>
    %cst_19 = arith.constant dense<0.000000e+00> : vector<8x128xf32>
    %75 = tpu.matmul %74, %3, %cst_19 {dimension_numbers = #tpu.dot_dimension_numbers<[1], [0], [0], [1], [0, 0, 1, 1], [], []>} : vector<8x32xbf16>, vector<32x128xbf16>, vector<8x128xf32> -> vector<8x128xf32>
    %76 = arith.addf %73, %75 : vector<8x128xf32>
    %77 = vector.extract_strided_slice %76 {offsets = [0, 0], sizes = [8, 96], strides = [1, 1]} : vector<8x128xf32> to vector<8x96xf32>
    %78 = arith.negf %77 : vector<8x96xf32>
    %79 = math.exp %78 : vector<8x96xf32>
    %cst_20 = arith.constant 1.000000e+00 : f32
    %80 = vector.broadcast %cst_20 : f32 to vector<8x96xf32>
    %81 = arith.addf %80, %79 : vector<8x96xf32>
    %82 = arith.divf %80, %81 : vector<8x96xf32>
    %83 = vector.extract_strided_slice %82 {offsets = [0, 0], sizes = [8, 32], strides = [1, 1]} : vector<8x96xf32> to vector<8x32xf32>
    %84 = vector.extract_strided_slice %82 {offsets = [0, 32], sizes = [8, 32], strides = [1, 1]} : vector<8x96xf32> to vector<8x32xf32>
    %85 = vector.extract_strided_slice %82 {offsets = [0, 64], sizes = [8, 32], strides = [1, 1]} : vector<8x96xf32> to vector<8x32xf32>
    %86 = vector.extract_strided_slice %76 {offsets = [0, 96], sizes = [8, 32], strides = [1, 1]} : vector<8x128xf32> to vector<8x32xf32>
    %87 = math.tanh %86 : vector<8x32xf32>
    %88 = arith.mulf %84, %69 : vector<8x32xf32>
    %89 = arith.mulf %83, %87 : vector<8x32xf32>
    %90 = arith.addf %88, %89 : vector<8x32xf32>
    %91 = math.tanh %90 : vector<8x32xf32>
    %92 = arith.mulf %85, %91 : vector<8x32xf32>
    %c24 = arith.constant 24 : index
    %c0_21 = arith.constant 0 : index
    %93 = vector.load %arg14[%c24, %c0_21] : memref<64x32xf32, #tpu.memory_space<vmem>>, vector<8x32xf32>
    tpu.vector_store %arg14[%c24, %c0_21], %92 {strides = array<i32>} : memref<64x32xf32, #tpu.memory_space<vmem>>, vector<8x32xf32>,
    %94 = vector.extract_strided_slice %7 {offsets = [32, 0], sizes = [8, 128], strides = [1, 1]} : vector<64x128xf32> to vector<8x128xf32>
    %95 = arith.truncf %92 : vector<8x32xf32> to vector<8x32xbf16>
    %cst_22 = arith.constant dense<0.000000e+00> : vector<8x128xf32>
    %96 = tpu.matmul %95, %3, %cst_22 {dimension_numbers = #tpu.dot_dimension_numbers<[1], [0], [0], [1], [0, 0, 1, 1], [], []>} : vector<8x32xbf16>, vector<32x128xbf16>, vector<8x128xf32> -> vector<8x128xf32>
    %97 = arith.addf %94, %96 : vector<8x128xf32>
    %98 = vector.extract_strided_slice %97 {offsets = [0, 0], sizes = [8, 96], strides = [1, 1]} : vector<8x128xf32> to vector<8x96xf32>
    %99 = arith.negf %98 : vector<8x96xf32>
    %100 = math.exp %99 : vector<8x96xf32>
    %cst_23 = arith.constant 1.000000e+00 : f32
    %101 = vector.broadcast %cst_23 : f32 to vector<8x96xf32>
    %102 = arith.addf %101, %100 : vector<8x96xf32>
    %103 = arith.divf %101, %102 : vector<8x96xf32>
    %104 = vector.extract_strided_slice %103 {offsets = [0, 0], sizes = [8, 32], strides = [1, 1]} : vector<8x96xf32> to vector<8x32xf32>
    %105 = vector.extract_strided_slice %103 {offsets = [0, 32], sizes = [8, 32], strides = [1, 1]} : vector<8x96xf32> to vector<8x32xf32>
    %106 = vector.extract_strided_slice %103 {offsets = [0, 64], sizes = [8, 32], strides = [1, 1]} : vector<8x96xf32> to vector<8x32xf32>
    %107 = vector.extract_strided_slice %97 {offsets = [0, 96], sizes = [8, 32], strides = [1, 1]} : vector<8x128xf32> to vector<8x32xf32>
    %108 = math.tanh %107 : vector<8x32xf32>
    %109 = arith.mulf %105, %90 : vector<8x32xf32>
    %110 = arith.mulf %104, %108 : vector<8x32xf32>
    %111 = arith.addf %109, %110 : vector<8x32xf32>
    %112 = math.tanh %111 : vector<8x32xf32>
    %113 = arith.mulf %106, %112 : vector<8x32xf32>
    %c32 = arith.constant 32 : index
    %c0_24 = arith.constant 0 : index
    %114 = vector.load %arg14[%c32, %c0_24] : memref<64x32xf32, #tpu.memory_space<vmem>>, vector<8x32xf32>
    tpu.vector_store %arg14[%c32, %c0_24], %113 {strides = array<i32>} : memref<64x32xf32, #tpu.memory_space<vmem>>, vector<8x32xf32>,
    %115 = vector.extract_strided_slice %7 {offsets = [40, 0], sizes = [8, 128], strides = [1, 1]} : vector<64x128xf32> to vector<8x128xf32>
    %116 = arith.truncf %113 : vector<8x32xf32> to vector<8x32xbf16>
    %cst_25 = arith.constant dense<0.000000e+00> : vector<8x128xf32>
    %117 = tpu.matmul %116, %3, %cst_25 {dimension_numbers = #tpu.dot_dimension_numbers<[1], [0], [0], [1], [0, 0, 1, 1], [], []>} : vector<8x32xbf16>, vector<32x128xbf16>, vector<8x128xf32> -> vector<8x128xf32>
    %118 = arith.addf %115, %117 : vector<8x128xf32>
    %119 = vector.extract_strided_slice %118 {offsets = [0, 0], sizes = [8, 96], strides = [1, 1]} : vector<8x128xf32> to vector<8x96xf32>
    %120 = arith.negf %119 : vector<8x96xf32>
    %121 = math.exp %120 : vector<8x96xf32>
    %cst_26 = arith.constant 1.000000e+00 : f32
    %122 = vector.broadcast %cst_26 : f32 to vector<8x96xf32>
    %123 = arith.addf %122, %121 : vector<8x96xf32>
    %124 = arith.divf %122, %123 : vector<8x96xf32>
    %125 = vector.extract_strided_slice %124 {offsets = [0, 0], sizes = [8, 32], strides = [1, 1]} : vector<8x96xf32> to vector<8x32xf32>
    %126 = vector.extract_strided_slice %124 {offsets = [0, 32], sizes = [8, 32], strides = [1, 1]} : vector<8x96xf32> to vector<8x32xf32>
    %127 = vector.extract_strided_slice %124 {offsets = [0, 64], sizes = [8, 32], strides = [1, 1]} : vector<8x96xf32> to vector<8x32xf32>
    %128 = vector.extract_strided_slice %118 {offsets = [0, 96], sizes = [8, 32], strides = [1, 1]} : vector<8x128xf32> to vector<8x32xf32>
    %129 = math.tanh %128 : vector<8x32xf32>
    %130 = arith.mulf %126, %111 : vector<8x32xf32>
    %131 = arith.mulf %125, %129 : vector<8x32xf32>
    %132 = arith.addf %130, %131 : vector<8x32xf32>
    %133 = math.tanh %132 : vector<8x32xf32>
    %134 = arith.mulf %127, %133 : vector<8x32xf32>
    %c40 = arith.constant 40 : index
    %c0_27 = arith.constant 0 : index
    %135 = vector.load %arg14[%c40, %c0_27] : memref<64x32xf32, #tpu.memory_space<vmem>>, vector<8x32xf32>
    tpu.vector_store %arg14[%c40, %c0_27], %134 {strides = array<i32>} : memref<64x32xf32, #tpu.memory_space<vmem>>, vector<8x32xf32>,
    %136 = vector.extract_strided_slice %7 {offsets = [48, 0], sizes = [8, 128], strides = [1, 1]} : vector<64x128xf32> to vector<8x128xf32>
    %137 = arith.truncf %134 : vector<8x32xf32> to vector<8x32xbf16>
    %cst_28 = arith.constant dense<0.000000e+00> : vector<8x128xf32>
    %138 = tpu.matmul %137, %3, %cst_28 {dimension_numbers = #tpu.dot_dimension_numbers<[1], [0], [0], [1], [0, 0, 1, 1], [], []>} : vector<8x32xbf16>, vector<32x128xbf16>, vector<8x128xf32> -> vector<8x128xf32>
    %139 = arith.addf %136, %138 : vector<8x128xf32>
    %140 = vector.extract_strided_slice %139 {offsets = [0, 0], sizes = [8, 96], strides = [1, 1]} : vector<8x128xf32> to vector<8x96xf32>
    %141 = arith.negf %140 : vector<8x96xf32>
    %142 = math.exp %141 : vector<8x96xf32>
    %cst_29 = arith.constant 1.000000e+00 : f32
    %143 = vector.broadcast %cst_29 : f32 to vector<8x96xf32>
    %144 = arith.addf %143, %142 : vector<8x96xf32>
    %145 = arith.divf %143, %144 : vector<8x96xf32>
    %146 = vector.extract_strided_slice %145 {offsets = [0, 0], sizes = [8, 32], strides = [1, 1]} : vector<8x96xf32> to vector<8x32xf32>
    %147 = vector.extract_strided_slice %145 {offsets = [0, 32], sizes = [8, 32], strides = [1, 1]} : vector<8x96xf32> to vector<8x32xf32>
    %148 = vector.extract_strided_slice %145 {offsets = [0, 64], sizes = [8, 32], strides = [1, 1]} : vector<8x96xf32> to vector<8x32xf32>
    %149 = vector.extract_strided_slice %139 {offsets = [0, 96], sizes = [8, 32], strides = [1, 1]} : vector<8x128xf32> to vector<8x32xf32>
    %150 = math.tanh %149 : vector<8x32xf32>
    %151 = arith.mulf %147, %132 : vector<8x32xf32>
    %152 = arith.mulf %146, %150 : vector<8x32xf32>
    %153 = arith.addf %151, %152 : vector<8x32xf32>
    %154 = math.tanh %153 : vector<8x32xf32>
    %155 = arith.mulf %148, %154 : vector<8x32xf32>
    %c48 = arith.constant 48 : index
    %c0_30 = arith.constant 0 : index
    %156 = vector.load %arg14[%c48, %c0_30] : memref<64x32xf32, #tpu.memory_space<vmem>>, vector<8x32xf32>
    tpu.vector_store %arg14[%c48, %c0_30], %155 {strides = array<i32>} : memref<64x32xf32, #tpu.memory_space<vmem>>, vector<8x32xf32>,
    %157 = vector.extract_strided_slice %7 {offsets = [56, 0], sizes = [8, 128], strides = [1, 1]} : vector<64x128xf32> to vector<8x128xf32>
    %158 = arith.truncf %155 : vector<8x32xf32> to vector<8x32xbf16>
    %cst_31 = arith.constant dense<0.000000e+00> : vector<8x128xf32>
    %159 = tpu.matmul %158, %3, %cst_31 {dimension_numbers = #tpu.dot_dimension_numbers<[1], [0], [0], [1], [0, 0, 1, 1], [], []>} : vector<8x32xbf16>, vector<32x128xbf16>, vector<8x128xf32> -> vector<8x128xf32>
    %160 = arith.addf %157, %159 : vector<8x128xf32>
    %161 = vector.extract_strided_slice %160 {offsets = [0, 0], sizes = [8, 96], strides = [1, 1]} : vector<8x128xf32> to vector<8x96xf32>
    %162 = arith.negf %161 : vector<8x96xf32>
    %163 = math.exp %162 : vector<8x96xf32>
    %cst_32 = arith.constant 1.000000e+00 : f32
    %164 = vector.broadcast %cst_32 : f32 to vector<8x96xf32>
    %165 = arith.addf %164, %163 : vector<8x96xf32>
    %166 = arith.divf %164, %165 : vector<8x96xf32>
    %167 = vector.extract_strided_slice %166 {offsets = [0, 0], sizes = [8, 32], strides = [1, 1]} : vector<8x96xf32> to vector<8x32xf32>
    %168 = vector.extract_strided_slice %166 {offsets = [0, 32], sizes = [8, 32], strides = [1, 1]} : vector<8x96xf32> to vector<8x32xf32>
    %169 = vector.extract_strided_slice %166 {offsets = [0, 64], sizes = [8, 32], strides = [1, 1]} : vector<8x96xf32> to vector<8x32xf32>
    %170 = vector.extract_strided_slice %160 {offsets = [0, 96], sizes = [8, 32], strides = [1, 1]} : vector<8x128xf32> to vector<8x32xf32>
    %171 = math.tanh %170 : vector<8x32xf32>
    %172 = arith.mulf %168, %153 : vector<8x32xf32>
    %173 = arith.mulf %167, %171 : vector<8x32xf32>
    %174 = arith.addf %172, %173 : vector<8x32xf32>
    %175 = math.tanh %174 : vector<8x32xf32>
    %176 = arith.mulf %169, %175 : vector<8x32xf32>
    %c56 = arith.constant 56 : index
    %c0_33 = arith.constant 0 : index
    %177 = vector.load %arg14[%c56, %c0_33] : memref<64x32xf32, #tpu.memory_space<vmem>>, vector<8x32xf32>
    tpu.vector_store %arg14[%c56, %c0_33], %176 {strides = array<i32>} : memref<64x32xf32, #tpu.memory_space<vmem>>, vector<8x32xf32>,
    %c0_34 = arith.constant 0 : index
    %c0_35 = arith.constant 0 : index
    %178 = vector.load %arg14[%c0_34, %c0_35] : memref<64x32xf32, #tpu.memory_space<vmem>>, vector<64x32xf32>
    %179 = arith.truncf %178 : vector<64x32xf32> to vector<64x32xbf16>
    %c0_36 = arith.constant 0 : index
    %c0_37 = arith.constant 0 : index
    %180 = vector.load %arg4[%c0_36, %c0_37] : memref<32x128xbf16, #tpu.memory_space<vmem>>, vector<32x128xbf16>
    %c0_38 = arith.constant 0 : index
    %c0_39 = arith.constant 0 : index
    %181 = vector.load %arg5[%c0_38, %c0_39] : memref<32x128xbf16, #tpu.memory_space<vmem>>, vector<32x128xbf16>
    %c0_40 = arith.constant 0 : index
    %c0_41 = arith.constant 0 : index
    %182 = vector.load %arg6[%c0_40, %c0_41] : memref<1x128xf32, #tpu.memory_space<vmem>>, vector<1x128xf32>
    %cst_42 = arith.constant dense<0.000000e+00> : vector<64x128xf32>
    %183 = tpu.matmul %179, %180, %cst_42 {dimension_numbers = #tpu.dot_dimension_numbers<[1], [0], [0], [1], [0, 0, 1, 1], [], []>} : vector<64x32xbf16>, vector<32x128xbf16>, vector<64x128xf32> -> vector<64x128xf32>
    %184 = vector.broadcast %182 : vector<1x128xf32> to vector<64x128xf32>
    %185 = arith.addf %183, %184 : vector<64x128xf32>
    %cst_43 = arith.constant 0.000000e+00 : f32
    %186 = vector.broadcast %cst_43 : f32 to vector<8x32xf32>
    %cst_44 = arith.constant 0.000000e+00 : f32
    %187 = vector.broadcast %cst_44 : f32 to vector<8x32xf32>
    %188 = vector.extract_strided_slice %185 {offsets = [0, 0], sizes = [8, 128], strides = [1, 1]} : vector<64x128xf32> to vector<8x128xf32>
    %189 = arith.truncf %186 : vector<8x32xf32> to vector<8x32xbf16>
    %cst_45 = arith.constant dense<0.000000e+00> : vector<8x128xf32>
    %190 = tpu.matmul %189, %181, %cst_45 {dimension_numbers = #tpu.dot_dimension_numbers<[1], [0], [0], [1], [0, 0, 1, 1], [], []>} : vector<8x32xbf16>, vector<32x128xbf16>, vector<8x128xf32> -> vector<8x128xf32>
    %191 = arith.addf %188, %190 : vector<8x128xf32>
    %192 = vector.extract_strided_slice %191 {offsets = [0, 0], sizes = [8, 96], strides = [1, 1]} : vector<8x128xf32> to vector<8x96xf32>
    %193 = arith.negf %192 : vector<8x96xf32>
    %194 = math.exp %193 : vector<8x96xf32>
    %cst_46 = arith.constant 1.000000e+00 : f32
    %195 = vector.broadcast %cst_46 : f32 to vector<8x96xf32>
    %196 = arith.addf %195, %194 : vector<8x96xf32>
    %197 = arith.divf %195, %196 : vector<8x96xf32>
    %198 = vector.extract_strided_slice %197 {offsets = [0, 0], sizes = [8, 32], strides = [1, 1]} : vector<8x96xf32> to vector<8x32xf32>
    %199 = vector.extract_strided_slice %197 {offsets = [0, 32], sizes = [8, 32], strides = [1, 1]} : vector<8x96xf32> to vector<8x32xf32>
    %200 = vector.extract_strided_slice %197 {offsets = [0, 64], sizes = [8, 32], strides = [1, 1]} : vector<8x96xf32> to vector<8x32xf32>
    %201 = vector.extract_strided_slice %191 {offsets = [0, 96], sizes = [8, 32], strides = [1, 1]} : vector<8x128xf32> to vector<8x32xf32>
    %202 = math.tanh %201 : vector<8x32xf32>
    %203 = arith.mulf %199, %187 : vector<8x32xf32>
    %204 = arith.mulf %198, %202 : vector<8x32xf32>
    %205 = arith.addf %203, %204 : vector<8x32xf32>
    %206 = math.tanh %205 : vector<8x32xf32>
    %207 = arith.mulf %200, %206 : vector<8x32xf32>
    %208 = vector.extract_strided_slice %185 {offsets = [8, 0], sizes = [8, 128], strides = [1, 1]} : vector<64x128xf32> to vector<8x128xf32>
    %209 = arith.truncf %207 : vector<8x32xf32> to vector<8x32xbf16>
    %cst_47 = arith.constant dense<0.000000e+00> : vector<8x128xf32>
    %210 = tpu.matmul %209, %181, %cst_47 {dimension_numbers = #tpu.dot_dimension_numbers<[1], [0], [0], [1], [0, 0, 1, 1], [], []>} : vector<8x32xbf16>, vector<32x128xbf16>, vector<8x128xf32> -> vector<8x128xf32>
    %211 = arith.addf %208, %210 : vector<8x128xf32>
    %212 = vector.extract_strided_slice %211 {offsets = [0, 0], sizes = [8, 96], strides = [1, 1]} : vector<8x128xf32> to vector<8x96xf32>
    %213 = arith.negf %212 : vector<8x96xf32>
    %214 = math.exp %213 : vector<8x96xf32>
    %cst_48 = arith.constant 1.000000e+00 : f32
    %215 = vector.broadcast %cst_48 : f32 to vector<8x96xf32>
    %216 = arith.addf %215, %214 : vector<8x96xf32>
    %217 = arith.divf %215, %216 : vector<8x96xf32>
    %218 = vector.extract_strided_slice %217 {offsets = [0, 0], sizes = [8, 32], strides = [1, 1]} : vector<8x96xf32> to vector<8x32xf32>
    %219 = vector.extract_strided_slice %217 {offsets = [0, 32], sizes = [8, 32], strides = [1, 1]} : vector<8x96xf32> to vector<8x32xf32>
    %220 = vector.extract_strided_slice %217 {offsets = [0, 64], sizes = [8, 32], strides = [1, 1]} : vector<8x96xf32> to vector<8x32xf32>
    %221 = vector.extract_strided_slice %211 {offsets = [0, 96], sizes = [8, 32], strides = [1, 1]} : vector<8x128xf32> to vector<8x32xf32>
    %222 = math.tanh %221 : vector<8x32xf32>
    %223 = arith.mulf %219, %205 : vector<8x32xf32>
    %224 = arith.mulf %218, %222 : vector<8x32xf32>
    %225 = arith.addf %223, %224 : vector<8x32xf32>
    %226 = math.tanh %225 : vector<8x32xf32>
    %227 = arith.mulf %220, %226 : vector<8x32xf32>
    %228 = vector.extract_strided_slice %185 {offsets = [16, 0], sizes = [8, 128], strides = [1, 1]} : vector<64x128xf32> to vector<8x128xf32>
    %229 = arith.truncf %227 : vector<8x32xf32> to vector<8x32xbf16>
    %cst_49 = arith.constant dense<0.000000e+00> : vector<8x128xf32>
    %230 = tpu.matmul %229, %181, %cst_49 {dimension_numbers = #tpu.dot_dimension_numbers<[1], [0], [0], [1], [0, 0, 1, 1], [], []>} : vector<8x32xbf16>, vector<32x128xbf16>, vector<8x128xf32> -> vector<8x128xf32>
    %231 = arith.addf %228, %230 : vector<8x128xf32>
    %232 = vector.extract_strided_slice %231 {offsets = [0, 0], sizes = [8, 96], strides = [1, 1]} : vector<8x128xf32> to vector<8x96xf32>
    %233 = arith.negf %232 : vector<8x96xf32>
    %234 = math.exp %233 : vector<8x96xf32>
    %cst_50 = arith.constant 1.000000e+00 : f32
    %235 = vector.broadcast %cst_50 : f32 to vector<8x96xf32>
    %236 = arith.addf %235, %234 : vector<8x96xf32>
    %237 = arith.divf %235, %236 : vector<8x96xf32>
    %238 = vector.extract_strided_slice %237 {offsets = [0, 0], sizes = [8, 32], strides = [1, 1]} : vector<8x96xf32> to vector<8x32xf32>
    %239 = vector.extract_strided_slice %237 {offsets = [0, 32], sizes = [8, 32], strides = [1, 1]} : vector<8x96xf32> to vector<8x32xf32>
    %240 = vector.extract_strided_slice %237 {offsets = [0, 64], sizes = [8, 32], strides = [1, 1]} : vector<8x96xf32> to vector<8x32xf32>
    %241 = vector.extract_strided_slice %231 {offsets = [0, 96], sizes = [8, 32], strides = [1, 1]} : vector<8x128xf32> to vector<8x32xf32>
    %242 = math.tanh %241 : vector<8x32xf32>
    %243 = arith.mulf %239, %225 : vector<8x32xf32>
    %244 = arith.mulf %238, %242 : vector<8x32xf32>
    %245 = arith.addf %243, %244 : vector<8x32xf32>
    %246 = math.tanh %245 : vector<8x32xf32>
    %247 = arith.mulf %240, %246 : vector<8x32xf32>
    %248 = vector.extract_strided_slice %185 {offsets = [24, 0], sizes = [8, 128], strides = [1, 1]} : vector<64x128xf32> to vector<8x128xf32>
    %249 = arith.truncf %247 : vector<8x32xf32> to vector<8x32xbf16>
    %cst_51 = arith.constant dense<0.000000e+00> : vector<8x128xf32>
    %250 = tpu.matmul %249, %181, %cst_51 {dimension_numbers = #tpu.dot_dimension_numbers<[1], [0], [0], [1], [0, 0, 1, 1], [], []>} : vector<8x32xbf16>, vector<32x128xbf16>, vector<8x128xf32> -> vector<8x128xf32>
    %251 = arith.addf %248, %250 : vector<8x128xf32>
    %252 = vector.extract_strided_slice %251 {offsets = [0, 0], sizes = [8, 96], strides = [1, 1]} : vector<8x128xf32> to vector<8x96xf32>
    %253 = arith.negf %252 : vector<8x96xf32>
    %254 = math.exp %253 : vector<8x96xf32>
    %cst_52 = arith.constant 1.000000e+00 : f32
    %255 = vector.broadcast %cst_52 : f32 to vector<8x96xf32>
    %256 = arith.addf %255, %254 : vector<8x96xf32>
    %257 = arith.divf %255, %256 : vector<8x96xf32>
    %258 = vector.extract_strided_slice %257 {offsets = [0, 0], sizes = [8, 32], strides = [1, 1]} : vector<8x96xf32> to vector<8x32xf32>
    %259 = vector.extract_strided_slice %257 {offsets = [0, 32], sizes = [8, 32], strides = [1, 1]} : vector<8x96xf32> to vector<8x32xf32>
    %260 = vector.extract_strided_slice %257 {offsets = [0, 64], sizes = [8, 32], strides = [1, 1]} : vector<8x96xf32> to vector<8x32xf32>
    %261 = vector.extract_strided_slice %251 {offsets = [0, 96], sizes = [8, 32], strides = [1, 1]} : vector<8x128xf32> to vector<8x32xf32>
    %262 = math.tanh %261 : vector<8x32xf32>
    %263 = arith.mulf %259, %245 : vector<8x32xf32>
    %264 = arith.mulf %258, %262 : vector<8x32xf32>
    %265 = arith.addf %263, %264 : vector<8x32xf32>
    %266 = math.tanh %265 : vector<8x32xf32>
    %267 = arith.mulf %260, %266 : vector<8x32xf32>
    %268 = vector.extract_strided_slice %185 {offsets = [32, 0], sizes = [8, 128], strides = [1, 1]} : vector<64x128xf32> to vector<8x128xf32>
    %269 = arith.truncf %267 : vector<8x32xf32> to vector<8x32xbf16>
    %cst_53 = arith.constant dense<0.000000e+00> : vector<8x128xf32>
    %270 = tpu.matmul %269, %181, %cst_53 {dimension_numbers = #tpu.dot_dimension_numbers<[1], [0], [0], [1], [0, 0, 1, 1], [], []>} : vector<8x32xbf16>, vector<32x128xbf16>, vector<8x128xf32> -> vector<8x128xf32>
    %271 = arith.addf %268, %270 : vector<8x128xf32>
    %272 = vector.extract_strided_slice %271 {offsets = [0, 0], sizes = [8, 96], strides = [1, 1]} : vector<8x128xf32> to vector<8x96xf32>
    %273 = arith.negf %272 : vector<8x96xf32>
    %274 = math.exp %273 : vector<8x96xf32>
    %cst_54 = arith.constant 1.000000e+00 : f32
    %275 = vector.broadcast %cst_54 : f32 to vector<8x96xf32>
    %276 = arith.addf %275, %274 : vector<8x96xf32>
    %277 = arith.divf %275, %276 : vector<8x96xf32>
    %278 = vector.extract_strided_slice %277 {offsets = [0, 0], sizes = [8, 32], strides = [1, 1]} : vector<8x96xf32> to vector<8x32xf32>
    %279 = vector.extract_strided_slice %277 {offsets = [0, 32], sizes = [8, 32], strides = [1, 1]} : vector<8x96xf32> to vector<8x32xf32>
    %280 = vector.extract_strided_slice %277 {offsets = [0, 64], sizes = [8, 32], strides = [1, 1]} : vector<8x96xf32> to vector<8x32xf32>
    %281 = vector.extract_strided_slice %271 {offsets = [0, 96], sizes = [8, 32], strides = [1, 1]} : vector<8x128xf32> to vector<8x32xf32>
    %282 = math.tanh %281 : vector<8x32xf32>
    %283 = arith.mulf %279, %265 : vector<8x32xf32>
    %284 = arith.mulf %278, %282 : vector<8x32xf32>
    %285 = arith.addf %283, %284 : vector<8x32xf32>
    %286 = math.tanh %285 : vector<8x32xf32>
    %287 = arith.mulf %280, %286 : vector<8x32xf32>
    %288 = vector.extract_strided_slice %185 {offsets = [40, 0], sizes = [8, 128], strides = [1, 1]} : vector<64x128xf32> to vector<8x128xf32>
    %289 = arith.truncf %287 : vector<8x32xf32> to vector<8x32xbf16>
    %cst_55 = arith.constant dense<0.000000e+00> : vector<8x128xf32>
    %290 = tpu.matmul %289, %181, %cst_55 {dimension_numbers = #tpu.dot_dimension_numbers<[1], [0], [0], [1], [0, 0, 1, 1], [], []>} : vector<8x32xbf16>, vector<32x128xbf16>, vector<8x128xf32> -> vector<8x128xf32>
    %291 = arith.addf %288, %290 : vector<8x128xf32>
    %292 = vector.extract_strided_slice %291 {offsets = [0, 0], sizes = [8, 96], strides = [1, 1]} : vector<8x128xf32> to vector<8x96xf32>
    %293 = arith.negf %292 : vector<8x96xf32>
    %294 = math.exp %293 : vector<8x96xf32>
    %cst_56 = arith.constant 1.000000e+00 : f32
    %295 = vector.broadcast %cst_56 : f32 to vector<8x96xf32>
    %296 = arith.addf %295, %294 : vector<8x96xf32>
    %297 = arith.divf %295, %296 : vector<8x96xf32>
    %298 = vector.extract_strided_slice %297 {offsets = [0, 0], sizes = [8, 32], strides = [1, 1]} : vector<8x96xf32> to vector<8x32xf32>
    %299 = vector.extract_strided_slice %297 {offsets = [0, 32], sizes = [8, 32], strides = [1, 1]} : vector<8x96xf32> to vector<8x32xf32>
    %300 = vector.extract_strided_slice %297 {offsets = [0, 64], sizes = [8, 32], strides = [1, 1]} : vector<8x96xf32> to vector<8x32xf32>
    %301 = vector.extract_strided_slice %291 {offsets = [0, 96], sizes = [8, 32], strides = [1, 1]} : vector<8x128xf32> to vector<8x32xf32>
    %302 = math.tanh %301 : vector<8x32xf32>
    %303 = arith.mulf %299, %285 : vector<8x32xf32>
    %304 = arith.mulf %298, %302 : vector<8x32xf32>
    %305 = arith.addf %303, %304 : vector<8x32xf32>
    %306 = math.tanh %305 : vector<8x32xf32>
    %307 = arith.mulf %300, %306 : vector<8x32xf32>
    %308 = vector.extract_strided_slice %185 {offsets = [48, 0], sizes = [8, 128], strides = [1, 1]} : vector<64x128xf32> to vector<8x128xf32>
    %309 = arith.truncf %307 : vector<8x32xf32> to vector<8x32xbf16>
    %cst_57 = arith.constant dense<0.000000e+00> : vector<8x128xf32>
    %310 = tpu.matmul %309, %181, %cst_57 {dimension_numbers = #tpu.dot_dimension_numbers<[1], [0], [0], [1], [0, 0, 1, 1], [], []>} : vector<8x32xbf16>, vector<32x128xbf16>, vector<8x128xf32> -> vector<8x128xf32>
    %311 = arith.addf %308, %310 : vector<8x128xf32>
    %312 = vector.extract_strided_slice %311 {offsets = [0, 0], sizes = [8, 96], strides = [1, 1]} : vector<8x128xf32> to vector<8x96xf32>
    %313 = arith.negf %312 : vector<8x96xf32>
    %314 = math.exp %313 : vector<8x96xf32>
    %cst_58 = arith.constant 1.000000e+00 : f32
    %315 = vector.broadcast %cst_58 : f32 to vector<8x96xf32>
    %316 = arith.addf %315, %314 : vector<8x96xf32>
    %317 = arith.divf %315, %316 : vector<8x96xf32>
    %318 = vector.extract_strided_slice %317 {offsets = [0, 0], sizes = [8, 32], strides = [1, 1]} : vector<8x96xf32> to vector<8x32xf32>
    %319 = vector.extract_strided_slice %317 {offsets = [0, 32], sizes = [8, 32], strides = [1, 1]} : vector<8x96xf32> to vector<8x32xf32>
    %320 = vector.extract_strided_slice %317 {offsets = [0, 64], sizes = [8, 32], strides = [1, 1]} : vector<8x96xf32> to vector<8x32xf32>
    %321 = vector.extract_strided_slice %311 {offsets = [0, 96], sizes = [8, 32], strides = [1, 1]} : vector<8x128xf32> to vector<8x32xf32>
    %322 = math.tanh %321 : vector<8x32xf32>
    %323 = arith.mulf %319, %305 : vector<8x32xf32>
    %324 = arith.mulf %318, %322 : vector<8x32xf32>
    %325 = arith.addf %323, %324 : vector<8x32xf32>
    %326 = math.tanh %325 : vector<8x32xf32>
    %327 = arith.mulf %320, %326 : vector<8x32xf32>
    %328 = vector.extract_strided_slice %185 {offsets = [56, 0], sizes = [8, 128], strides = [1, 1]} : vector<64x128xf32> to vector<8x128xf32>
    %329 = arith.truncf %327 : vector<8x32xf32> to vector<8x32xbf16>
    %cst_59 = arith.constant dense<0.000000e+00> : vector<8x128xf32>
    %330 = tpu.matmul %329, %181, %cst_59 {dimension_numbers = #tpu.dot_dimension_numbers<[1], [0], [0], [1], [0, 0, 1, 1], [], []>} : vector<8x32xbf16>, vector<32x128xbf16>, vector<8x128xf32> -> vector<8x128xf32>
    %331 = arith.addf %328, %330 : vector<8x128xf32>
    %332 = vector.extract_strided_slice %331 {offsets = [0, 0], sizes = [8, 96], strides = [1, 1]} : vector<8x128xf32> to vector<8x96xf32>
    %333 = arith.negf %332 : vector<8x96xf32>
    %334 = math.exp %333 : vector<8x96xf32>
    %cst_60 = arith.constant 1.000000e+00 : f32
    %335 = vector.broadcast %cst_60 : f32 to vector<8x96xf32>
    %336 = arith.addf %335, %334 : vector<8x96xf32>
    %337 = arith.divf %335, %336 : vector<8x96xf32>
    %338 = vector.extract_strided_slice %337 {offsets = [0, 0], sizes = [8, 32], strides = [1, 1]} : vector<8x96xf32> to vector<8x32xf32>
    %339 = vector.extract_strided_slice %337 {offsets = [0, 32], sizes = [8, 32], strides = [1, 1]} : vector<8x96xf32> to vector<8x32xf32>
    %340 = vector.extract_strided_slice %337 {offsets = [0, 64], sizes = [8, 32], strides = [1, 1]} : vector<8x96xf32> to vector<8x32xf32>
    %341 = vector.extract_strided_slice %331 {offsets = [0, 96], sizes = [8, 32], strides = [1, 1]} : vector<8x128xf32> to vector<8x32xf32>
    %342 = math.tanh %341 : vector<8x32xf32>
    %343 = arith.mulf %339, %325 : vector<8x32xf32>
    %344 = arith.mulf %338, %342 : vector<8x32xf32>
    %345 = arith.addf %343, %344 : vector<8x32xf32>
    %346 = math.tanh %345 : vector<8x32xf32>
    %347 = arith.mulf %340, %346 : vector<8x32xf32>
    %348 = arith.truncf %347 : vector<8x32xf32> to vector<8x32xbf16>
    %c0_61 = arith.constant 0 : index
    %c0_62 = arith.constant 0 : index
    %349 = vector.load %arg7[%c0_61, %c0_62] : memref<32x64xbf16, #tpu.memory_space<vmem>>, vector<32x64xbf16>
    %cst_63 = arith.constant dense<0.000000e+00> : vector<8x64xf32>
    %350 = tpu.matmul %348, %349, %cst_63 {dimension_numbers = #tpu.dot_dimension_numbers<[1], [0], [0], [1], [0, 0, 1, 1], [], []>} : vector<8x32xbf16>, vector<32x64xbf16>, vector<8x64xf32> -> vector<8x64xf32>
    %c0_64 = arith.constant 0 : index
    %c0_65 = arith.constant 0 : index
    %351 = vector.load %arg8[%c0_64, %c0_65] : memref<1x64xf32, #tpu.memory_space<vmem>>, vector<1x64xf32>
    %352 = vector.broadcast %351 : vector<1x64xf32> to vector<8x64xf32>
    %353 = arith.addf %350, %352 : vector<8x64xf32>
    %cst_66 = arith.constant 0.000000e+00 : f32
    %354 = vector.broadcast %cst_66 : f32 to vector<8x64xf32>
    %355 = arith.maximumf %353, %354 : vector<8x64xf32>
    %356 = arith.truncf %355 : vector<8x64xf32> to vector<8x64xbf16>
    %c0_67 = arith.constant 0 : index
    %c0_68 = arith.constant 0 : index
    %357 = vector.load %arg9[%c0_67, %c0_68] : memref<64x64xbf16, #tpu.memory_space<vmem>>, vector<64x64xbf16>
    %cst_69 = arith.constant dense<0.000000e+00> : vector<8x64xf32>
    %358 = tpu.matmul %356, %357, %cst_69 {dimension_numbers = #tpu.dot_dimension_numbers<[1], [0], [0], [1], [0, 0, 1, 1], [], []>} : vector<8x64xbf16>, vector<64x64xbf16>, vector<8x64xf32> -> vector<8x64xf32>
    %c0_70 = arith.constant 0 : index
    %c0_71 = arith.constant 0 : index
    %359 = vector.load %arg10[%c0_70, %c0_71] : memref<1x64xf32, #tpu.memory_space<vmem>>, vector<1x64xf32>
    %360 = vector.broadcast %359 : vector<1x64xf32> to vector<8x64xf32>
    %361 = arith.addf %358, %360 : vector<8x64xf32>
    %cst_72 = arith.constant 0.000000e+00 : f32
    %362 = vector.broadcast %cst_72 : f32 to vector<8x64xf32>
    %363 = arith.maximumf %361, %362 : vector<8x64xf32>
    %364 = arith.truncf %363 : vector<8x64xf32> to vector<8x64xbf16>
    %c0_73 = arith.constant 0 : index
    %c0_74 = arith.constant 0 : index
    %365 = vector.load %arg11[%c0_73, %c0_74] : memref<64x4xbf16, #tpu.memory_space<vmem>>, vector<64x4xbf16>
    %cst_75 = arith.constant dense<0.000000e+00> : vector<8x4xf32>
    %366 = tpu.matmul %364, %365, %cst_75 {dimension_numbers = #tpu.dot_dimension_numbers<[1], [0], [0], [1], [0, 0, 1, 1], [], []>} : vector<8x64xbf16>, vector<64x4xbf16>, vector<8x4xf32> -> vector<8x4xf32>
    %c0_76 = arith.constant 0 : index
    %c0_77 = arith.constant 0 : index
    %367 = vector.load %arg12[%c0_76, %c0_77] : memref<1x4xf32, #tpu.memory_space<vmem>>, vector<1x4xf32>
    %368 = vector.broadcast %367 : vector<1x4xf32> to vector<8x4xf32>
    %369 = arith.addf %366, %368 : vector<8x4xf32>
    %c0_78 = arith.constant 0 : index
    %c0_79 = arith.constant 0 : index
    %370 = vector.load %arg13[%c0_78, %c0_79] : memref<8x4xf32, #tpu.memory_space<vmem>>, vector<8x4xf32>
    tpu.vector_store %arg13[%c0_78, %c0_79], %369 {strides = array<i32>} : memref<8x4xf32, #tpu.memory_space<vmem>>, vector<8x4xf32>,
    return
  }
}

</mosaic_0001>

<bundles_post_ra>
// kernel: tpu_custom_call.1
= control target key start
LH: loop header
LB: loop body
LE: loop exit
PB: predicated region body
PF: predicated region fallthrough
CT: control target
= control target key end

     0   :  { %vm82_vm0 = vcmask 1043456   ;;  %v2184_v1 = vmov 0.0   ;;  %vm2185_vm1 = vmmov 0   ;;  %vm69_vm2 = vcmask 64512   ;;  %s2187_s22 = smov 32   ;;  %s2673_s1 = inlined_call_operand.vmem [shape: bf16[8,128], index: 1, kind: input, shape index: {}]   ;;  %s2674_s2 = inlined_call_operand.vmem [shape: bf16[32,128], index: 2, kind: input, shape index: {}]   ;;  %s2675_s0 = inlined_call_operand.vmem [shape: f32[64,8], index: 0, kind: input, shape index: {}]   ;;  %s2676_s3 = inlined_call_operand.vmem [shape: f32[1,128], index: 3, kind: input, shape index: {}]   ;;  %s2677_s4 = inlined_call_operand.vmem [shape: bf16[32,128], index: 4, kind: input, shape index: {}]   ;;  %s2678_s5 = inlined_call_operand.vmem [shape: bf16[32,128], index: 5, kind: input, shape index: {}]   ;;  %s2679_s6 = inlined_call_operand.vmem [shape: f32[1,128], index: 6, kind: input, shape index: {}]   ;;  %s2680_s7 = inlined_call_operand.vmem [shape: bf16[32,64], index: 7, kind: input, shape index: {}]   ;;  %s2681_s9 = inlined_call_operand.vmem [shape: bf16[64,64], index: 9, kind: input, shape index: {}]   ;;  %s2682_s11 = inlined_call_operand.vmem [shape: bf16[64,4], index: 11, kind: input, shape index: {}]   ;;  %s2683_s8 = inlined_call_operand.vmem [shape: f32[1,64], index: 8, kind: input, shape index: {}]   ;;  %s2684_s10 = inlined_call_operand.vmem [shape: f32[1,64], index: 10, kind: input, shape index: {}]   ;;  %s2685_s12 = inlined_call_operand.vmem [shape: f32[1,4], index: 12, kind: input, shape index: {}]   ;;  %s2686_s13 = inlined_call_operand.vmem [shape: f32[8,4], index: 13, kind: output, shape index: {}]  }
   0x1   :  { %v57_v0 = vld [vmem:[%s2673_s1] sm:$0xf]  ;;  %1862 = vmatprep.subr.bf16.mxu1 %v2184_v1  ;;  %1866 = vmatprep.mubr.msk.bf16.mxu1 %vm2185_vm1, %v2184_v1  ;;  %v2268_v3 = vld [vmem:[%s2674_s2 + $0x8] sm:$0xff]   ;;  %v47_v7 = vld [vmem:[%s2675_s0 + $0x10] sm:$0xff]  ;;  %v2186_v11 = vmov 0   ;;  %vm163_vm3 = vcmask 261120  }
   0x2   :  { %2034 = vmatprep.subr.msk.bf16.mxu0 %vm82_vm0, %v57_v0  ;;  %v84_v2 = vsel %vm82_vm0, %v57_v0, 0  ;;  %v45_v4 = vld [vmem:[%s2675_s0] sm:$0xff]  ;;  %v46_v5 = vld [vmem:[%s2675_s0 + $0x8] sm:$0xff]  ;;  %v48_v8 = vld [vmem:[%s2675_s0 + $0x18] sm:$0xff]  ;;  %1863 = vmatpush3.bf16.msra.mxu1 %v2268_v3  ;;  %vm1584_vm4 = vcmask 523264   ;;  %vm1712_vm5 = vcmask 31744  }
   0x3   :  { %1853 = vmatpush3.bf16.msra.mxu0 %v84_v2  ;;  %v53_v6 = vpack.c.bf16 %v46_v5, %v45_v4  ;;  %v54_v9 = vpack.c.bf16 %v48_v8, %v47_v7  ;;  %v2286_v10 = vld [vmem:[%s2674_s2] sm:$0xff]   ;;  %1864 = vmatprep.subr.bf16.mxu1 %v2184_v1  ;;  %v50_v55 = vld [vmem:[%s2675_s0 + $0x28] sm:$0xff]  ;;  %v51_v56 = vld [vmem:[%s2675_s0 + $0x30] sm:$0xff] }
   0x4   :  { %1878 = vmatprep.subr.bf16.mxu0 %v2184_v1  ;;  %v2310_v13 = vld [vmem:[%s2676_s3] ss:$0 sm:$0xff]  ;;  %s2188_s3 = smov 64   ;;  %v52_v58 = vld [vmem:[%s2675_s0 + $0x38] sm:$0xff] }
   0x5   :  { %1854 = vmatprep.mubr.msk.bf16.mxu0 %vm69_vm2, %v53_v6  ;;  %v49_v54 = vld [vmem:[%s2675_s0 + $0x20] sm:$0xff]  ;;  %v56_v59 = vpack.c.bf16 %v52_v58, %v51_v56 }
   0x6   :  { %1855 = vmatmul.mubr.msk.bf16.vlgmr.msra.gmra.mxu0 %vm69_vm2, %v54_v9  ;;  %1865 = vmatpush3.bf16.msra.mxu1 %v2286_v10  ;;  %v55_v57 = vpack.c.bf16 %v50_v55, %v49_v54 }
   0x7   :  { %1879 = vmatpush3.bf16.msra.mxu0 %v2268_v3  ;;  %1870 = vmatprep.subr.bf16.mxu1 %v2184_v1 }
   0x8   :  { %1880 = vmatprep.subr.bf16.mxu0 %v2184_v1  ;;  %1858 = vmatprep.mubr.msk.bf16.mxu0 %vm69_vm2, %v55_v57 }
   0x9   :  { %1867 = vmatmul.mubr.bf16.vlgmr.msra.gmra.mxu1 %v2186_v11 }
   0xa   :  { %1871 = vmatpush3.bf16.msra.mxu1 %v2268_v3  ;;  %1874 = vmatprep.mubr.msk.bf16.mxu1 %vm2185_vm1, %v2184_v1 }
   0xb   :  { %1881 = vmatpush3.bf16.msra.mxu0 %v2286_v10  ;;  %1872 = vmatprep.subr.bf16.mxu1 %v2184_v1 }
   0xc   :  { %1894 = vmatprep.subr.bf16.mxu0 %v2184_v1 }
   0xe   :  { %1873 = vmatpush3.bf16.msra.mxu1 %v2286_v10  ;;  %1859 = vmatmul.mubr.msk.bf16.gmra.mxu0 %vm69_vm2, %v56_v59 }
   0xf   :  { %1886 = vmatprep.subr.bf16.mxu1 %v2184_v1  ;;  %1882 = vmatprep.mubr.msk.bf16.mxu0 %vm2185_vm1, %v2184_v1 }
  0xc6   :  { %v2305_v12 = vpop.f32.mrf.mxu0 }
  0xc7   :  { %v129_v7 = vadd.f32 %v2305_v12, %v2310_v13 }
  0xc8   :  { %v120_v14 = vpop.f32.mrf.mxu0 }
  0xc9   :  { %v121_v15 = vadd.f32 %v2310_v13, %v120_v14  ;;  %v201_v16 = vpop.f32.mrf.mxu1 }
  0xca   :  { %v2328_v36 = vpop.f32.mrf.mxu0 }
  0xcb   :  { %v207_v17 = vadd.f32 %v201_v16, %v121_v15  ;;  %v1868_v18 = vpop.f32.mrf.mxu1 }
  0xcc   :  { %v123_v37 = vpop.f32.mrf.mxu0 }
  0xcd   :  { %2056 = vtanh.f32 %v207_v17  ;;  %v204_v19 = vpop.f32.mrf.mxu1  ;;  %v1725_v22 = vmul.f32 -1.442695, %v207_v17  ;;  %v124_v38 = vadd.f32 %v2310_v13, %v123_v37 }
  0xce   :  { %v2362_v2 = vpop.f32.mrf.mxu0 }
  0xcf   :  { %v1869_v20 = vpop.f32.mrf.mxu1  ;;  %2058 = vpow2.f32 %v1725_v22 }
  0xd0   :  { %v2364_v4 = vpop.f32.mrf.mxu0 }
  0xd2   :  { %v2366_v5 = vpop.f32.mrf.mxu0 }
  0xd4   :  { %v2368_v6 = vpop.f32.mrf.mxu0 }
  0xda   :  { %v2057_v21 = vpop.eup %2056 }
  0xdb   :  { %217 = vrot.lane.b32.xlu0 %v2057_v21, %s2187_s22 }
  0xdc   :  { %v2059_v23 = vpop.eup %2058 }
  0xdd   :  { %v211_v24 = vadd.f32 1.0, %v2059_v23 }
  0xdf   :  { %2060 = vrcp.f32 %v211_v24 }
  0xec   :  { %v2061_v25 = vpop.eup %2060 }
  0xed   :  { %v215_v28 = vmul.f32 0.0, %v2061_v25 }
 0x14d   :  { %v218_v26 = vpop.permute.xlu0 %217 }
 0x14e   :  { %v220_v27 = vmul.f32 %v2061_v25, %v218_v26 }
 0x150   :  { %222 = vrot.lane.b32.xlu0 %v220_v27, %s2187_s22 }
 0x1c2   :  { %v223_v29 = vpop.permute.xlu0 %222 }
 0x1c3   :  { %v225_v30 = vadd.f32 %v223_v29, %v215_v28 }
 0x1c5   :  { %2062 = vtanh.f32 %v225_v30 }
 0x1d2   :  { %v2063_v31 = vpop.eup %2062 }
 0x1d3   :  { %228 = vrot.lane.b32.xlu1 %v2063_v31, %s2187_s22  ;;  %v132_v31 = vadd.f32 %v2328_v36, %v2310_v13 }
 0x245   :  { %v229_v32 = vpop.permute.xlu1 %228 }
 0x246   :  { %v2316_v33 = vmul.f32 %v2061_v25, %v229_v32 }
 0x248   :  { %v237_v34 = vpack.c.bf16 %v2316_v33, %v2316_v33 }
 0x24a   :  { %239 = vrot.lane.b32.xlu1 %v237_v34, %s2188_s3 }
 0x2bc   :  { %v240_v35 = vpop.permute.xlu1 %239 }
 0x2bd   :  { %1875 = vmatmul.mubr.msk.bf16.vlgmr.msra.gmra.mxu1 %vm163_vm3, %v240_v35 }
 0x2be   :  { %1887 = vmatpush3.bf16.msra.mxu1 %v2268_v3  ;;  %1890 = vmatprep.mubr.msk.bf16.mxu1 %vm2185_vm1, %v2184_v1 }
 0x2bf   :  { %1888 = vmatprep.subr.bf16.mxu1 %v2184_v1 }
 0x2c2   :  { %1889 = vmatpush3.bf16.msra.mxu1 %v2286_v10 }
 0x2c3   :  { %1902 = vmatprep.subr.bf16.mxu1 %v2184_v1 }
 0x37d   :  { %v278_v39 = vpop.f32.mrf.mxu1 }
 0x37e   :  { %v284_v40 = vadd.f32 %v278_v39, %v124_v38 }
 0x37f   :  { %v1876_v41 = vpop.f32.mrf.mxu1 }
 0x380   :  { %2064 = vtanh.f32 %v284_v40  ;;  %v1727_v45 = vmul.f32 -1.442695, %v284_v40 }
 0x381   :  { %v281_v42 = vpop.f32.mrf.mxu1 }
 0x382   :  { %2066 = vpow2.f32 %v1727_v45 }
 0x383   :  { %v1877_v43 = vpop.f32.mrf.mxu1 }
 0x38d   :  { %v2065_v44 = vpop.eup %2064 }
 0x38e   :  { %294 = vrot.lane.b32.xlu0 %v2065_v44, %s2187_s22 }
 0x38f   :  { %v2067_v46 = vpop.eup %2066 }
 0x390   :  { %v288_v47 = vadd.f32 1.0, %v2067_v46 }
 0x392   :  { %2068 = vrcp.f32 %v288_v47 }
 0x39f   :  { %v2069_v48 = vpop.eup %2068 }
 0x3a0   :  { %v292_v51 = vmul.f32 %v2069_v48, %v225_v30 }
 0x400   :  { %v295_v49 = vpop.permute.xlu0 %294 }
 0x401   :  { %v297_v50 = vmul.f32 %v2069_v48, %v295_v49 }
 0x403   :  { %299 = vrot.lane.b32.xlu1 %v297_v50, %s2187_s22 }
 0x475   :  { %v300_v52 = vpop.permute.xlu1 %299 }
 0x476   :  { %v302_v53 = vadd.f32 %v300_v52, %v292_v51 }
 0x478   :  { %2070 = vtanh.f32 %v302_v53 }
 0x485   :  { %v2071_v60 = vpop.eup %2070 }
 0x486   :  { %305 = vrot.lane.b32.xlu0 %v2071_v60, %s2187_s22 }
 0x4f8   :  { %v306_v61 = vpop.permute.xlu0 %305 }
 0x4f9   :  { %v2350_v62 = vmul.f32 %v2069_v48, %v306_v61 }
 0x4fb   :  { %v314_v63 = vpack.c.bf16 %v2350_v62, %v2350_v62 }
 0x4fd   :  { %316 = vrot.lane.b32.xlu1 %v314_v63, %s2188_s3 }
 0x56f   :  { %v317_v0 = vpop.permute.xlu1 %316 }
 0x570   :  { %1883 = vmatmul.mubr.msk.bf16.vlgmr.msra.gmra.mxu0 %vm163_vm3, %v317_v0 }
 0x571   :  { %1895 = vmatpush3.bf16.msra.mxu0 %v2268_v3  ;;  %1898 = vmatprep.mubr.msk.bf16.mxu0 %vm2185_vm1, %v2184_v1 }
 0x572   :  { %1896 = vmatprep.subr.bf16.mxu0 %v2184_v1 }
 0x575   :  { %1897 = vmatpush3.bf16.msra.mxu0 %v2286_v10 }
 0x576   :  { %1910 = vmatprep.subr.bf16.mxu0 %v2184_v1 }
 0x630   :  { %v355_v8 = vpop.f32.mrf.mxu0 }
 0x631   :  { %v361_v9 = vadd.f32 %v355_v8, %v129_v7 }
 0x632   :  { %v1884_v14 = vpop.f32.mrf.mxu0 }
 0x633   :  { %2072 = vtanh.f32 %v361_v9  ;;  %v1729_v18 = vmul.f32 -1.442695, %v361_v9 }
 0x634   :  { %v358_v15 = vpop.f32.mrf.mxu0 }
 0x635   :  { %2074 = vpow2.f32 %v1729_v18 }
 0x636   :  { %v1885_v16 = vpop.f32.mrf.mxu0 }
 0x640   :  { %v2073_v17 = vpop.eup %2072 }
 0x641   :  { %371 = vrot.lane.b32.xlu0 %v2073_v17, %s2187_s22 }
 0x642   :  { %v2075_v19 = vpop.eup %2074 }
 0x643   :  { %v365_v20 = vadd.f32 1.0, %v2075_v19 }
 0x645   :  { %2076 = vrcp.f32 %v365_v20  ;;  %v140_v20 = vadd.f32 %v2310_v13, %v2368_v6 }
 0x652   :  { %v2077_v21 = vpop.eup %2076 }
 0x653   :  { %v369_v12 = vmul.f32 %v2077_v21, %v302_v53  ;;  %v137_v53 = vadd.f32 %v2310_v13, %v2364_v4 }
 0x6b3   :  { %v372_v22 = vpop.permute.xlu0 %371 }
 0x6b4   :  { %v374_v23 = vmul.f32 %v2077_v21, %v372_v22 }
 0x6b6   :  { %376 = vrot.lane.b32.xlu1 %v374_v23, %s2187_s22 }
 0x728   :  { %v377_v24 = vpop.permute.xlu1 %376 }
 0x729   :  { %v379_v25 = vadd.f32 %v377_v24, %v369_v12 }
 0x72b   :  { %2078 = vtanh.f32 %v379_v25 }
 0x738   :  { %v2079_v26 = vpop.eup %2078 }
 0x739   :  { %382 = vrot.lane.b32.xlu0 %v2079_v26, %s2187_s22 }
 0x7ab   :  { %v383_v27 = vpop.permute.xlu0 %382 }
 0x7ac   :  { %v2375_v28 = vmul.f32 %v2077_v21, %v383_v27 }
 0x7ae   :  { %v391_v29 = vpack.c.bf16 %v2375_v28, %v2375_v28 }
 0x7b0   :  { %393 = vrot.lane.b32.xlu1 %v391_v29, %s2188_s3 }
 0x822   :  { %v394_v30 = vpop.permute.xlu1 %393 }
 0x823   :  { %1891 = vmatmul.mubr.msk.bf16.vlgmr.msra.gmra.mxu1 %vm163_vm3, %v394_v30 }
 0x824   :  { %1903 = vmatpush3.bf16.msra.mxu1 %v2268_v3  ;;  %1906 = vmatprep.mubr.msk.bf16.mxu1 %vm2185_vm1, %v2184_v1 }
 0x825   :  { %1904 = vmatprep.subr.bf16.mxu1 %v2184_v1 }
 0x828   :  { %1905 = vmatpush3.bf16.msra.mxu1 %v2286_v10 }
 0x829   :  { %1918 = vmatprep.subr.bf16.mxu1 %v2184_v1 }
 0x8e3   :  { %v432_v32 = vpop.f32.mrf.mxu1 }
 0x8e4   :  { %v438_v34 = vadd.f32 %v432_v32, %v132_v31 }
 0x8e5   :  { %v1892_v35 = vpop.f32.mrf.mxu1 }
 0x8e6   :  { %2080 = vtanh.f32 %v438_v34  ;;  %v1731_v40 = vmul.f32 -1.442695, %v438_v34 }
 0x8e7   :  { %v435_v37 = vpop.f32.mrf.mxu1 }
 0x8e8   :  { %2082 = vpow2.f32 %v1731_v40  ;;  %v145_v40 = vadd.f32 %v2362_v2, %v2310_v13 }
 0x8e9   :  { %v1893_v38 = vpop.f32.mrf.mxu1 }
 0x8f3   :  { %v2081_v39 = vpop.eup %2080 }
 0x8f4   :  { %448 = vrot.lane.b32.xlu0 %v2081_v39, %s2187_s22 }
 0x8f5   :  { %v2083_v41 = vpop.eup %2082 }
 0x8f6   :  { %v442_v42 = vadd.f32 1.0, %v2083_v41 }
 0x8f8   :  { %2084 = vrcp.f32 %v442_v42 }
 0x905   :  { %v2085_v43 = vpop.eup %2084 }
 0x906   :  { %v446_v36 = vmul.f32 %v2085_v43, %v379_v25 }
 0x966   :  { %v449_v44 = vpop.permute.xlu0 %448 }
 0x967   :  { %v451_v45 = vmul.f32 %v2085_v43, %v449_v44 }
 0x969   :  { %453 = vrot.lane.b32.xlu1 %v451_v45, %s2187_s22 }
 0x9db   :  { %v454_v46 = vpop.permute.xlu1 %453 }
 0x9dc   :  { %v456_v47 = vadd.f32 %v454_v46, %v446_v36 }
 0x9de   :  { %2086 = vtanh.f32 %v456_v47 }
 0x9eb   :  { %v2087_v48 = vpop.eup %2086 }
 0x9ec   :  { %459 = vrot.lane.b32.xlu0 %v2087_v48, %s2187_s22 }
 0xa5e   :  { %v460_v49 = vpop.permute.xlu0 %459 }
 0xa5f   :  { %v2392_v50 = vmul.f32 %v2085_v43, %v460_v49 }
 0xa61   :  { %v468_v51 = vpack.c.bf16 %v2392_v50, %v2392_v50 }
 0xa63   :  { %470 = vrot.lane.b32.xlu1 %v468_v51, %s2188_s3 }
 0xad5   :  { %v471_v52 = vpop.permute.xlu1 %470 }
 0xad6   :  { %1899 = vmatmul.mubr.msk.bf16.vlgmr.msra.gmra.mxu0 %vm163_vm3, %v471_v52 }
 0xad7   :  { %1911 = vmatpush3.bf16.msra.mxu0 %v2268_v3  ;;  %1914 = vmatprep.mubr.msk.bf16.mxu0 %vm2185_vm1, %v2184_v1 }
 0xad8   :  { %1912 = vmatprep.subr.bf16.mxu0 %v2184_v1 }
 0xadb   :  { %1913 = vmatpush3.bf16.msra.mxu0 %v2286_v10 }
 0xb96   :  { %v509_v54 = vpop.f32.mrf.mxu0 }
 0xb97   :  { %v515_v55 = vadd.f32 %v509_v54, %v137_v53 }
 0xb98   :  { %v1900_v56 = vpop.f32.mrf.mxu0 }
 0xb99   :  { %2088 = vtanh.f32 %v515_v55  ;;  %v1733_v60 = vmul.f32 -1.442695, %v515_v55 }
 0xb9a   :  { %v512_v57 = vpop.f32.mrf.mxu0 }
 0xb9b   :  { %2090 = vpow2.f32 %v1733_v60  ;;  %v2042_v57 = vld [vmem:[%s2677_s4 + $0x8] sm:$0xff]  }
 0xb9c   :  { %v1901_v58 = vpop.f32.mrf.mxu0  ;;  %1926 = vmatprep.subr.bf16.mxu0 %v2042_v57 }
 0xba6   :  { %v2089_v59 = vpop.eup %2088 }
 0xba7   :  { %525 = vrot.lane.b32.xlu0 %v2089_v59, %s2187_s22 }
 0xba8   :  { %v2091_v61 = vpop.eup %2090 }
 0xba9   :  { %v519_v63 = vadd.f32 1.0, %v2091_v61 }
 0xbab   :  { %2092 = vrcp.f32 %v519_v63 }
 0xbb8   :  { %v2093_v0 = vpop.eup %2092 }
 0xbb9   :  { %v523_v4 = vmul.f32 %v2093_v0, %v456_v47 }
 0xc19   :  { %v526_v7 = vpop.permute.xlu0 %525 }
 0xc1a   :  { %v528_v8 = vmul.f32 %v2093_v0, %v526_v7 }
 0xc1c   :  { %530 = vrot.lane.b32.xlu1 %v528_v8, %s2187_s22 }
 0xc8e   :  { %v531_v9 = vpop.permute.xlu1 %530 }
 0xc8f   :  { %v533_v14 = vadd.f32 %v531_v9, %v523_v4  ;;  %v2467_v9 = vld [vmem:[%s2678_s5 + $0x8] sm:$0xff]  }
 0xc91   :  { %2094 = vtanh.f32 %v533_v14 }
 0xc9e   :  { %v2095_v15 = vpop.eup %2094 }
 0xc9f   :  { %536 = vrot.lane.b32.xlu0 %v2095_v15, %s2187_s22 }
 0xd11   :  { %v537_v16 = vpop.permute.xlu0 %536 }
 0xd12   :  { %v2408_v17 = vmul.f32 %v2093_v0, %v537_v16  ;;  %v148_v16 = vadd.f32 %v2366_v5, %v2310_v13 }
 0xd14   :  { %v545_v18 = vpack.c.bf16 %v2408_v17, %v2408_v17 }
 0xd16   :  { %547 = vrot.lane.b32.xlu1 %v545_v18, %s2188_s3 }
 0xd88   :  { %v548_v19 = vpop.permute.xlu1 %547 }
 0xd89   :  { %1907 = vmatmul.mubr.msk.bf16.vlgmr.msra.gmra.mxu1 %vm163_vm3, %v548_v19 }
 0xd8a   :  { %1919 = vmatpush3.bf16.msra.mxu1 %v2268_v3  ;;  %1922 = vmatprep.mubr.msk.bf16.mxu1 %vm2185_vm1, %v2184_v1 }
 0xd8b   :  { %1920 = vmatprep.subr.bf16.mxu1 %v2184_v1 }
 0xd8e   :  { %1921 = vmatpush3.bf16.msra.mxu1 %v2286_v10 }
 0xd8f   :  { %1938 = vmatprep.subr.bf16.mxu1 %v2184_v1 }
 0xe49   :  { %v586_v21 = vpop.f32.mrf.mxu1 }
 0xe4a   :  { %v592_v22 = vadd.f32 %v586_v21, %v140_v20 }
 0xe4b   :  { %v1908_v23 = vpop.f32.mrf.mxu1 }
 0xe4c   :  { %2096 = vtanh.f32 %v592_v22  ;;  %v1735_v3 = vmul.f32 -1.442695, %v592_v22  ;;  %v2500_v23 = vld [vmem:[%s2679_s6] ss:$0 sm:$0xff] }
 0xe4d   :  { %v589_v12 = vpop.f32.mrf.mxu1 }
 0xe4e   :  { %2098 = vpow2.f32 %v1735_v3 }
 0xe4f   :  { %v1909_v24 = vpop.f32.mrf.mxu1 }
 0xe59   :  { %v2097_v25 = vpop.eup %2096 }
 0xe5a   :  { %602 = vrot.lane.b32.xlu0 %v2097_v25, %s2187_s22 }
 0xe5b   :  { %v2099_v26 = vpop.eup %2098 }
 0xe5c   :  { %v596_v27 = vadd.f32 1.0, %v2099_v26 }
 0xe5e   :  { %2100 = vrcp.f32 %v596_v27 }
 0xe6b   :  { %v2101_v10 = vpop.eup %2100 }
 0xe6c   :  { %v600_v6 = vmul.f32 %v2101_v10, %v533_v14  ;;  %v2475_v14 = vld [vmem:[%s2678_s5] sm:$0xff]  }
 0xecc   :  { %v603_v29 = vpop.permute.xlu0 %602 }
 0xecd   :  { %v605_v30 = vmul.f32 %v2101_v10, %v603_v29 }
 0xecf   :  { %607 = vrot.lane.b32.xlu1 %v605_v30, %s2187_s22 }
 0xf41   :  { %v608_v31 = vpop.permute.xlu1 %607 }
 0xf42   :  { %v610_v32 = vadd.f32 %v608_v31, %v600_v6 }
 0xf44   :  { %2102 = vtanh.f32 %v610_v32 }
 0xf51   :  { %v2103_v34 = vpop.eup %2102 }
 0xf52   :  { %613 = vrot.lane.b32.xlu0 %v2103_v34, %s2187_s22 }
 0xfc4   :  { %v614_v35 = vpop.permute.xlu0 %613 }
 0xfc5   :  { %v2425_v37 = vmul.f32 %v2101_v10, %v614_v35 }
 0xfc7   :  { %v622_v38 = vpack.c.bf16 %v2425_v37, %v2425_v37 }
 0xfc9   :  { %624 = vrot.lane.b32.xlu1 %v622_v38, %s2188_s3 }
0x103b   :  { %v625_v39 = vpop.permute.xlu1 %624 }
0x103c   :  { %1915 = vmatmul.mubr.msk.bf16.vlgmr.msra.gmra.mxu0 %vm163_vm3, %v625_v39 }
0x103d   :  { %1927 = vmatpush3.bf16.msra.mxu0 %v2042_v57 }
0x10fc   :  { %v663_v41 = vpop.f32.mrf.mxu0 }
0x10fd   :  { %v669_v42 = vadd.f32 %v663_v41, %v145_v40 }
0x10fe   :  { %v1916_v43 = vpop.f32.mrf.mxu0 }
0x10ff   :  { %2104 = vtanh.f32 %v669_v42  ;;  %v1737_v46 = vmul.f32 -1.442695, %v669_v42 }
0x1100   :  { %v666_v44 = vpop.f32.mrf.mxu0 }
0x1101   :  { %2106 = vpow2.f32 %v1737_v46 }
0x1102   :  { %v1917_v45 = vpop.f32.mrf.mxu0 }
0x110c   :  { %v2105_v36 = vpop.eup %2104 }
0x110d   :  { %679 = vrot.lane.b32.xlu0 %v2105_v36, %s2187_s22 }
0x110e   :  { %v2107_v47 = vpop.eup %2106 }
0x110f   :  { %v673_v48 = vadd.f32 1.0, %v2107_v47 }
0x1111   :  { %2108 = vrcp.f32 %v673_v48 }
0x111e   :  { %v2109_v49 = vpop.eup %2108 }
0x111f   :  { %v677_v2 = vmul.f32 %v2109_v49, %v610_v32 }
0x117f   :  { %v680_v51 = vpop.permute.xlu0 %679 }
0x1180   :  { %v682_v52 = vmul.f32 %v2109_v49, %v680_v51 }
0x1182   :  { %684 = vrot.lane.b32.xlu1 %v682_v52, %s2187_s22 }
0x1186   :  { %233 = vrot.lane.b32.xlu1 %v2316_v33, %s2188_s3  ;;  %v2043_v33 = vld [vmem:[%s2677_s4] sm:$0xff]  }
0x1187   :  { %1928 = vmatprep.subr.bf16.mxu0 %v2043_v33 }
0x1188   :  { %1929 = vmatpush3.bf16.msra.mxu0 %v2043_v33 }
0x1189   :  { %1954 = vmatprep.subr.bf16.mxu0 %v2184_v1 }
0x118a   :  { %387 = vrot.lane.b32.xlu1 %v2375_v28, %s2188_s3 }
0x11f4   :  { %v685_v53 = vpop.permute.xlu1 %684 }
0x11f5   :  { %v2439_v54 = vadd.f32 %v685_v53, %v677_v2 }
0x11f7   :  { %2110 = vtanh.f32 %v2439_v54 }
0x11f8   :  { %v234_v55 = vpop.permute.xlu1 %233 }
0x11f9   :  { %236 = vst.msk [vmem:[#allocation2] sm:$0xff] %vm163_vm3, %v234_v55 }
0x11fc   :  { %v388_v56 = vpop.permute.xlu1 %387 }
0x11fd   :  { %390 = vst.msk [vmem:[#allocation2 + $0x10] sm:$0xff] %vm163_vm3, %v388_v56 }
0x1200   :  { %v776_v0 = vld [vmem:[#allocation2] sm:$0xff] }
0x1204   :  { %v2111_v28 = vpop.eup %2110 }
0x1205   :  { %690 = vrot.lane.b32.xlu0 %v2111_v28, %s2187_s22 }
0x1209   :  { %310 = vrot.lane.b32.xlu0 %v2350_v62, %s2188_s3 }
0x120d   :  { %464 = vrot.lane.b32.xlu0 %v2392_v50, %s2188_s3  ;;  %v778_v50 = vld [vmem:[#allocation2 + $0x10] sm:$0xff] }
0x1277   :  { %v691_v58 = vpop.permute.xlu0 %690 }
0x1278   :  { %v2456_v59 = vmul.f32 %v2109_v49, %v691_v58 }
0x127a   :  { %v699_v60 = vpack.c.bf16 %v2456_v59, %v2456_v59 }
0x127b   :  { %v311_v61 = vpop.permute.xlu0 %310 }
0x127c   :  { %313 = vst.msk [vmem:[#allocation2 + $0x8] sm:$0xff] %vm163_vm3, %v311_v61  ;;  %701 = vrot.lane.b32.xlu1 %v699_v60, %s2188_s3 }
0x127f   :  { %v465_v63 = vpop.permute.xlu0 %464 }
0x1280   :  { %467 = vst.msk [vmem:[#allocation2 + $0x18] sm:$0xff] %vm163_vm3, %v465_v63 }
0x1283   :  { %v777_v7 = vld [vmem:[#allocation2 + $0x8] sm:$0xff] }
0x1284   :  { %v784_v62 = vpack.c.bf16 %v777_v7, %v776_v0 }
0x1286   :  { %1930 = vmatprep.mubr.msk.bf16.mxu0 %vm163_vm3, %v784_v62 }
0x1287   :  { %v779_v8 = vld [vmem:[#allocation2 + $0x18] sm:$0xff] }
0x1288   :  { %v785_v4 = vpack.c.bf16 %v779_v8, %v778_v50 }
0x128a   :  { %1931 = vmatmul.mubr.msk.bf16.vlgmr.msra.gmra.mxu0 %vm163_vm3, %v785_v4 }
0x128b   :  { %1955 = vmatpush3.bf16.msra.mxu0 %v2467_v9 }
0x128c   :  { %1956 = vmatprep.subr.bf16.mxu0 %v2184_v1 }
0x128f   :  { %1957 = vmatpush3.bf16.msra.mxu0 %v2475_v14 }
0x1290   :  { %1970 = vmatprep.subr.bf16.mxu0 %v2184_v1 }
0x12ee   :  { %v702_v15 = vpop.permute.xlu1 %701 }
0x12ef   :  { %1923 = vmatmul.mubr.msk.bf16.vlgmr.msra.gmra.mxu1 %vm163_vm3, %v702_v15 }
0x12f0   :  { %1939 = vmatpush3.bf16.msra.mxu1 %v2467_v9  ;;  %1942 = vmatprep.mubr.msk.bf16.mxu1 %vm2185_vm1, %v2184_v1 }
0x12f1   :  { %1940 = vmatprep.subr.bf16.mxu1 %v2184_v1 }
0x12f4   :  { %1941 = vmatpush3.bf16.msra.mxu1 %v2475_v14 }
0x12f5   :  { %1946 = vmatprep.subr.bf16.mxu1 %v2184_v1 }
0x12f7   :  { %1943 = vmatmul.mubr.bf16.vlgmr.msra.gmra.mxu1 %v2186_v11 }
0x12f8   :  { %1947 = vmatpush3.bf16.msra.mxu1 %v2467_v9  ;;  %1950 = vmatprep.mubr.msk.bf16.mxu1 %vm2185_vm1, %v2184_v1 }
0x12f9   :  { %1948 = vmatprep.subr.bf16.mxu1 %v2184_v1 }
0x12fc   :  { %1949 = vmatpush3.bf16.msra.mxu1 %v2475_v14 }
0x12fd   :  { %1962 = vmatprep.subr.bf16.mxu1 %v2184_v1 }
0x134a   :  { %v2495_v18 = vpop.f32.mrf.mxu0 }
0x134c   :  { %v861_v11 = vpop.f32.mrf.mxu0 }
0x134d   :  { %v862_v24 = vadd.f32 %v2500_v23, %v861_v11 }
0x134e   :  { %v2524_v57 = vpop.f32.mrf.mxu0 }
0x1350   :  { %v864_v33 = vpop.f32.mrf.mxu0 }
0x1351   :  { %v865_v28 = vadd.f32 %v2500_v23, %v864_v33 }
0x13af   :  { %v740_v19 = vpop.f32.mrf.mxu1 }
0x13b0   :  { %v746_v20 = vadd.f32 %v740_v19, %v148_v16 }
0x13b1   :  { %v1924_v21 = vpop.f32.mrf.mxu1 }
0x13b2   :  { %v1739_v41 = vmul.f32 -1.442695, %v746_v20 }
0x13b3   :  { %v743_v22 = vpop.f32.mrf.mxu1 }
0x13b5   :  { %v1925_v12 = vpop.f32.mrf.mxu1 }
0x13b7   :  { %v938_v25 = vpop.f32.mrf.mxu1 }
0x13b8   :  { %v944_v3 = vadd.f32 %v938_v25, %v862_v24 }
0x13b9   :  { %v1944_v26 = vpop.f32.mrf.mxu1 }
0x13ba   :  { %2112 = vtanh.f32 %v944_v3  ;;  %v1749_v10 = vmul.f32 -1.442695, %v944_v3 }
0x13bb   :  { %v941_v13 = vpop.f32.mrf.mxu1 }
0x13bc   :  { %2114 = vpow2.f32 %v1749_v10 }
0x13bd   :  { %v1945_v5 = vpop.f32.mrf.mxu1 }
0x13c7   :  { %v2113_v27 = vpop.eup %2112 }
0x13c8   :  { %954 = vrot.lane.b32.xlu0 %v2113_v27, %s2187_s22 }
0x13c9   :  { %v2115_v29 = vpop.eup %2114 }
0x13ca   :  { %v948_v30 = vadd.f32 1.0, %v2115_v29 }
0x13cc   :  { %2116 = vrcp.f32 %v948_v30 }
0x13d9   :  { %v2117_v6 = vpop.eup %2116 }
0x13da   :  { %v952_v34 = vmul.f32 0.0, %v2117_v6 }
0x143a   :  { %v955_v31 = vpop.permute.xlu0 %954 }
0x143b   :  { %v957_v32 = vmul.f32 %v2117_v6, %v955_v31 }
0x143d   :  { %959 = vrot.lane.b32.xlu1 %v957_v32, %s2187_s22  ;;  %v870_v32 = vadd.f32 %v2495_v18, %v2500_v23 }
0x14af   :  { %v960_v35 = vpop.permute.xlu1 %959 }
0x14b0   :  { %v962_v38 = vadd.f32 %v960_v35, %v952_v34 }
0x14b2   :  { %2118 = vtanh.f32 %v962_v38 }
0x14b3   :  { %2120 = vtanh.f32 %v746_v20 }
0x14b4   :  { %2122 = vpow2.f32 %v1739_v41 }
0x14bf   :  { %v2119_v39 = vpop.eup %2118 }
0x14c0   :  { %965 = vrot.lane.b32.xlu0 %v2119_v39, %s2187_s22  ;;  %v2121_v40 = vpop.eup %2120 }
0x14c1   :  { %v2123_v42 = vpop.eup %2122 }
0x14c2   :  { %v750_v43 = vadd.f32 1.0, %v2123_v42 }
0x14c4   :  { %756 = vrot.lane.b32.xlu0 %v2121_v40, %s2187_s22  ;;  %2124 = vrcp.f32 %v750_v43 }
0x14d1   :  { %v2125_v46 = vpop.eup %2124 }
0x14d2   :  { %v754_v51 = vmul.f32 %v2125_v46, %v2439_v54 }
0x1532   :  { %v966_v44 = vpop.permute.xlu0 %965 }
0x1533   :  { %v968_v45 = vmul.f32 %v2117_v6, %v966_v44 }
0x1535   :  { %v969_v36 = vpack.c.bf16 %v968_v45, %v968_v45 }
0x1536   :  { %v757_v47 = vpop.permute.xlu0 %756 }
0x1537   :  { %v759_v48 = vmul.f32 %v2125_v46, %v757_v47  ;;  %971 = vrot.lane.b32.xlu1 %v969_v36, %s2188_s3 }
0x1539   :  { %761 = vrot.lane.b32.xlu0 %v759_v48, %s2187_s22 }
0x15a9   :  { %v972_v49 = vpop.permute.xlu1 %971 }
0x15aa   :  { %1951 = vmatmul.mubr.msk.bf16.vlgmr.msra.gmra.mxu1 %vm163_vm3, %v972_v49 }
0x15ab   :  { %v762_v52 = vpop.permute.xlu0 %761  ;;  %1963 = vmatpush3.bf16.msra.mxu1 %v2467_v9  ;;  %1966 = vmatprep.mubr.msk.bf16.mxu1 %vm2185_vm1, %v2184_v1 }
0x15ac   :  { %v764_v2 = vadd.f32 %v762_v52, %v754_v51  ;;  %1964 = vmatprep.subr.bf16.mxu1 %v2184_v1 }
0x15ae   :  { %2126 = vtanh.f32 %v764_v2 }
0x15af   :  { %1965 = vmatpush3.bf16.msra.mxu1 %v2475_v14 }
0x15b0   :  { %1978 = vmatprep.subr.bf16.mxu1 %v2184_v1 }
0x15bb   :  { %v2127_v53 = vpop.eup %2126 }
0x15bc   :  { %767 = vrot.lane.b32.xlu0 %v2127_v53, %s2187_s22 }
0x15c0   :  { %541 = vrot.lane.b32.xlu0 %v2408_v17, %s2188_s3 }
0x15c4   :  { %695 = vrot.lane.b32.xlu0 %v2456_v59, %s2188_s3 }
0x162e   :  { %v768_v54 = vpop.permute.xlu0 %767 }
0x162f   :  { %v770_v21 = vmul.f32 %v2125_v46, %v768_v54  ;;  %v873_v54 = vadd.f32 %v2524_v57, %v2500_v23 }
0x1632   :  { %v542_v55 = vpop.permute.xlu0 %541 }
0x1633   :  { %544 = vst.msk [vmem:[#allocation2 + $0x20] sm:$0xff] %vm163_vm3, %v542_v55 }
0x1636   :  { %v696_v56 = vpop.permute.xlu0 %695 }
0x1637   :  { %698 = vst.msk [vmem:[#allocation2 + $0x30] sm:$0xff] %vm163_vm3, %v696_v56 }
0x163a   :  { %v780_v3 = vld [vmem:[#allocation2 + $0x20] sm:$0xff] }
0x166a   :  { %v1010_v58 = vpop.f32.mrf.mxu1 }
0x166b   :  { %v1016_v60 = vadd.f32 %v1010_v58, %v865_v28 }
0x166c   :  { %v1952_v61 = vpop.f32.mrf.mxu1 }
0x166d   :  { %2128 = vtanh.f32 %v1016_v60  ;;  %v1751_v59 = vmul.f32 -1.442695, %v1016_v60 }
0x166e   :  { %v1013_v17 = vpop.f32.mrf.mxu1 }
0x166f   :  { %2130 = vpow2.f32 %v1751_v59 }
0x1670   :  { %v1953_v63 = vpop.f32.mrf.mxu1 }
0x167a   :  { %v2129_v0 = vpop.eup %2128 }
0x167b   :  { %1026 = vrot.lane.b32.xlu1 %v2129_v0, %s2187_s22 }
0x167c   :  { %v2131_v7 = vpop.eup %2130 }
0x167d   :  { %v1020_v62 = vadd.f32 1.0, %v2131_v7 }
0x167f   :  { %2132 = vrcp.f32 %v1020_v62 }
0x168c   :  { %v2133_v50 = vpop.eup %2132 }
0x168d   :  { %v1024_v15 = vmul.f32 %v2133_v50, %v962_v38 }
0x16ed   :  { %v1027_v8 = vpop.permute.xlu1 %1026 }
0x16ee   :  { %v1029_v4 = vmul.f32 %v2133_v50, %v1027_v8 }
0x16f0   :  { %1031 = vrot.lane.b32.xlu1 %v1029_v4, %s2187_s22 }
0x1762   :  { %v1032_v16 = vpop.permute.xlu1 %1031 }
0x1763   :  { %v1034_v19 = vadd.f32 %v1032_v16, %v1024_v15 }
0x1765   :  { %2134 = vtanh.f32 %v1034_v19 }
0x1772   :  { %v2135_v20 = vpop.eup %2134 }
0x1773   :  { %1037 = vrot.lane.b32.xlu1 %v2135_v20, %s2187_s22 }
0x1777   :  { %618 = vrot.lane.b32.xlu1 %v2425_v37, %s2188_s3  ;;  %v782_v37 = vld [vmem:[#allocation2 + $0x30] sm:$0xff] }
0x177b   :  { %772 = vrot.lane.b32.xlu1 %v770_v21, %s2188_s3 }
0x17e5   :  { %v1038_v11 = vpop.permute.xlu1 %1037 }
0x17e6   :  { %v1040_v22 = vmul.f32 %v2133_v50, %v1038_v11 }
0x17e8   :  { %v1041_v12 = vpack.c.bf16 %v1040_v22, %v1040_v22 }
0x17e9   :  { %v619_v24 = vpop.permute.xlu1 %618 }
0x17ea   :  { %621 = vst.msk [vmem:[#allocation2 + $0x28] sm:$0xff] %vm163_vm3, %v619_v24  ;;  %1043 = vrot.lane.b32.xlu0 %v1041_v12, %s2188_s3 }
0x17ed   :  { %v773_v25 = vpop.permute.xlu1 %772 }
0x17ee   :  { %775 = vst.msk [vmem:[#allocation2 + $0x38] sm:$0xff] %vm163_vm3, %v773_v25 }
0x17f1   :  { %v781_v26 = vld [vmem:[#allocation2 + $0x28] sm:$0xff] }
0x17f2   :  { %v786_v13 = vpack.c.bf16 %v781_v26, %v780_v3 }
0x17f4   :  { %1934 = vmatprep.mubr.msk.bf16.mxu0 %vm163_vm3, %v786_v13 }
0x17f5   :  { %v783_v5 = vld [vmem:[#allocation2 + $0x38] sm:$0xff] }
0x17f6   :  { %v787_v27 = vpack.c.bf16 %v783_v5, %v782_v37 }
0x17f8   :  { %1935 = vmatmul.mubr.msk.bf16.gmra.mxu0 %vm163_vm3, %v787_v27 }
0x17f9   :  { %1958 = vmatprep.mubr.msk.bf16.mxu0 %vm2185_vm1, %v2184_v1 }
0x185c   :  { %v1044_v10 = vpop.permute.xlu0 %1043 }
0x185d   :  { %1959 = vmatmul.mubr.msk.bf16.vlgmr.msra.gmra.mxu0 %vm163_vm3, %v1044_v10 }
0x185e   :  { %1971 = vmatpush3.bf16.msra.mxu0 %v2467_v9  ;;  %1974 = vmatprep.mubr.msk.bf16.mxu0 %vm2185_vm1, %v2184_v1 }
0x185f   :  { %1972 = vmatprep.subr.bf16.mxu0 %v2184_v1 }
0x1862   :  { %1973 = vmatpush3.bf16.msra.mxu0 %v2475_v14 }
0x1863   :  { %1986 = vmatprep.subr.bf16.mxu0 %v2184_v1 }
0x18b8   :  { %v2547_v29 = vpop.f32.mrf.mxu0 }
0x18ba   :  { %v2549_v30 = vpop.f32.mrf.mxu0 }
0x18bb   :  { %v878_v20 = vadd.f32 %v2500_v23, %v2549_v30 }
0x18bc   :  { %v2551_v6 = vpop.f32.mrf.mxu0 }
0x18be   :  { %v2553_v31 = vpop.f32.mrf.mxu0 }
0x191d   :  { %v1082_v34 = vpop.f32.mrf.mxu0 }
0x191e   :  { %v1088_v35 = vadd.f32 %v1082_v34, %v870_v32 }
0x191f   :  { %v1960_v38 = vpop.f32.mrf.mxu0 }
0x1920   :  { %2136 = vtanh.f32 %v1088_v35  ;;  %v1753_v42 = vmul.f32 -1.442695, %v1088_v35 }
0x1921   :  { %v1085_v39 = vpop.f32.mrf.mxu0 }
0x1922   :  { %2138 = vpow2.f32 %v1753_v42 }
0x1923   :  { %v1961_v40 = vpop.f32.mrf.mxu0 }
0x192d   :  { %v2137_v41 = vpop.eup %2136 }
0x192e   :  { %1098 = vrot.lane.b32.xlu1 %v2137_v41, %s2187_s22  ;;  %v881_v41 = vadd.f32 %v2500_v23, %v2553_v31 }
0x192f   :  { %v2139_v43 = vpop.eup %2138 }
0x1930   :  { %v1092_v44 = vadd.f32 1.0, %v2139_v43 }
0x1932   :  { %2140 = vrcp.f32 %v1092_v44 }
0x193f   :  { %v2141_v45 = vpop.eup %2140 }
0x1940   :  { %v1096_v18 = vmul.f32 %v2141_v45, %v1034_v19 }
0x19a0   :  { %v1099_v36 = vpop.permute.xlu1 %1098 }
0x19a1   :  { %v1101_v46 = vmul.f32 %v2141_v45, %v1099_v36 }
0x19a3   :  { %1103 = vrot.lane.b32.xlu0 %v1101_v46, %s2187_s22 }
0x1a15   :  { %v1104_v47 = vpop.permute.xlu0 %1103 }
0x1a16   :  { %v1106_v48 = vadd.f32 %v1104_v47, %v1096_v18 }
0x1a18   :  { %2142 = vtanh.f32 %v1106_v48 }
0x1a25   :  { %v2143_v49 = vpop.eup %2142 }
0x1a26   :  { %1109 = vrot.lane.b32.xlu1 %v2143_v49, %s2187_s22 }
0x1a98   :  { %v1110_v51 = vpop.permute.xlu1 %1109 }
0x1a99   :  { %v1112_v52 = vmul.f32 %v2141_v45, %v1110_v51 }
0x1a9b   :  { %v1113_v2 = vpack.c.bf16 %v1112_v52, %v1112_v52 }
0x1a9d   :  { %1115 = vrot.lane.b32.xlu0 %v1113_v2, %s2188_s3 }
0x1b0f   :  { %v1116_v53 = vpop.permute.xlu0 %1115 }
0x1b10   :  { %1967 = vmatmul.mubr.msk.bf16.vlgmr.msra.gmra.mxu1 %vm163_vm3, %v1116_v53 }
0x1b11   :  { %1979 = vmatpush3.bf16.msra.mxu1 %v2467_v9  ;;  %1982 = vmatprep.mubr.msk.bf16.mxu1 %vm2185_vm1, %v2184_v1 }
0x1b12   :  { %1980 = vmatprep.subr.bf16.mxu1 %v2184_v1 }
0x1b15   :  { %1981 = vmatpush3.bf16.msra.mxu1 %v2475_v14 }
0x1b16   :  { %1994 = vmatprep.subr.bf16.mxu1 %v2184_v1 }
0x1bd0   :  { %v1154_v55 = vpop.f32.mrf.mxu1 }
0x1bd1   :  { %v1160_v56 = vadd.f32 %v1154_v55, %v873_v54 }
0x1bd2   :  { %v1968_v33 = vpop.f32.mrf.mxu1 }
0x1bd3   :  { %2144 = vtanh.f32 %v1160_v56  ;;  %v1755_v61 = vmul.f32 -1.442695, %v1160_v56  ;;  %v886_v33 = vadd.f32 %v2547_v29, %v2500_v23 }
0x1bd4   :  { %v1157_v28 = vpop.f32.mrf.mxu1 }
0x1bd5   :  { %2146 = vpow2.f32 %v1755_v61 }
0x1bd6   :  { %v1969_v58 = vpop.f32.mrf.mxu1 }
0x1be0   :  { %v2145_v60 = vpop.eup %2144 }
0x1be1   :  { %1170 = vrot.lane.b32.xlu1 %v2145_v60, %s2187_s22 }
0x1be2   :  { %v2147_v17 = vpop.eup %2146 }
0x1be3   :  { %v1164_v63 = vadd.f32 1.0, %v2147_v17 }
0x1be5   :  { %2148 = vrcp.f32 %v1164_v63 }
0x1bf2   :  { %v2149_v0 = vpop.eup %2148 }
0x1bf3   :  { %v1168_v57 = vmul.f32 %v2149_v0, %v1106_v48 }
0x1c53   :  { %v1171_v59 = vpop.permute.xlu1 %1170 }
0x1c54   :  { %v1173_v7 = vmul.f32 %v2149_v0, %v1171_v59 }
0x1c56   :  { %1175 = vrot.lane.b32.xlu0 %v1173_v7, %s2187_s22 }
0x1cc8   :  { %v1176_v62 = vpop.permute.xlu0 %1175 }
0x1cc9   :  { %v1178_v50 = vadd.f32 %v1176_v62, %v1168_v57 }
0x1ccb   :  { %2150 = vtanh.f32 %v1178_v50 }
0x1cd8   :  { %v2151_v8 = vpop.eup %2150 }
0x1cd9   :  { %1181 = vrot.lane.b32.xlu1 %v2151_v8, %s2187_s22 }
0x1d4b   :  { %v1182_v4 = vpop.permute.xlu1 %1181 }
0x1d4c   :  { %v1184_v15 = vmul.f32 %v2149_v0, %v1182_v4 }
0x1d4e   :  { %v1185_v16 = vpack.c.bf16 %v1184_v15, %v1184_v15 }
0x1d50   :  { %1187 = vrot.lane.b32.xlu0 %v1185_v16, %s2188_s3 }
0x1dc2   :  { %v1188_v19 = vpop.permute.xlu0 %1187 }
0x1dc3   :  { %1975 = vmatmul.mubr.msk.bf16.vlgmr.msra.gmra.mxu0 %vm163_vm3, %v1188_v19 }
0x1dc4   :  { %1987 = vmatpush3.bf16.msra.mxu0 %v2467_v9  ;;  %1990 = vmatprep.mubr.msk.bf16.mxu0 %vm2185_vm1, %v2184_v1 }
0x1dc5   :  { %1988 = vmatprep.subr.bf16.mxu0 %v2184_v1 }
0x1dc8   :  { %1989 = vmatpush3.bf16.msra.mxu0 %v2475_v14 }
0x1dc9   :  { %2002 = vmatprep.subr.bf16.mxu0 %v2184_v1 }
0x1e83   :  { %v1226_v21 = vpop.f32.mrf.mxu0 }
0x1e84   :  { %v1232_v11 = vadd.f32 %v1226_v21, %v878_v20 }
0x1e85   :  { %v1976_v22 = vpop.f32.mrf.mxu0 }
0x1e86   :  { %2152 = vtanh.f32 %v1232_v11  ;;  %v1757_v3 = vmul.f32 -1.442695, %v1232_v11  ;;  %v889_v11 = vadd.f32 %v2551_v6, %v2500_v23 }
0x1e87   :  { %v1229_v12 = vpop.f32.mrf.mxu0 }
0x1e88   :  { %2154 = vpow2.f32 %v1757_v3 }
0x1e89   :  { %v1977_v24 = vpop.f32.mrf.mxu0 }
0x1e93   :  { %v2153_v25 = vpop.eup %2152 }
0x1e94   :  { %1242 = vrot.lane.b32.xlu1 %v2153_v25, %s2187_s22 }
0x1e95   :  { %v2155_v26 = vpop.eup %2154 }
0x1e96   :  { %v1236_v13 = vadd.f32 1.0, %v2155_v26 }
0x1e98   :  { %2156 = vrcp.f32 %v1236_v13 }
0x1ea5   :  { %v2157_v37 = vpop.eup %2156 }
0x1ea6   :  { %v1240_v10 = vmul.f32 %v2157_v37, %v1178_v50 }
0x1f06   :  { %v1243_v5 = vpop.permute.xlu1 %1242 }
0x1f07   :  { %v1245_v27 = vmul.f32 %v2157_v37, %v1243_v5 }
0x1f09   :  { %1247 = vrot.lane.b32.xlu0 %v1245_v27, %s2187_s22 }
0x1f7b   :  { %v1248_v30 = vpop.permute.xlu0 %1247 }
0x1f7c   :  { %v1250_v32 = vadd.f32 %v1248_v30, %v1240_v10 }
0x1f7e   :  { %2158 = vtanh.f32 %v1250_v32 }
0x1f8b   :  { %v2159_v34 = vpop.eup %2158 }
0x1f8c   :  { %1253 = vrot.lane.b32.xlu1 %v2159_v34, %s2187_s22  ;;  %v2046_v34 = vld [vmem:[%s2680_s7 + $0x8] sm:$0xff]  }
0x1ffe   :  { %v1254_v35 = vpop.permute.xlu1 %1253 }
0x1fff   :  { %v1256_v38 = vmul.f32 %v2157_v37, %v1254_v35  ;;  %v2047_v35 = vld [vmem:[%s2680_s7] sm:$0xff]  }
0x2001   :  { %v1257_v39 = vpack.c.bf16 %v1256_v38, %v1256_v38 }
0x2003   :  { %1259 = vrot.lane.b32.xlu0 %v1257_v39, %s2188_s3  ;;  %v2048_v39 = vld [vmem:[%s2681_s9 + $0x18] sm:$0xff]  }
0x2075   :  { %v1260_v40 = vpop.permute.xlu0 %1259 }
0x2076   :  { %1983 = vmatmul.mubr.msk.bf16.vlgmr.msra.gmra.mxu1 %vm163_vm3, %v1260_v40  ;;  %v2049_v40 = vld [vmem:[%s2681_s9 + $0x10] sm:$0xff]  }
0x2077   :  { %1995 = vmatpush3.bf16.msra.mxu1 %v2467_v9  ;;  %1998 = vmatprep.mubr.msk.bf16.mxu1 %vm2185_vm1, %v2184_v1 }
0x2078   :  { %1996 = vmatprep.subr.bf16.mxu1 %v2184_v1 }
0x207b   :  { %1997 = vmatpush3.bf16.msra.mxu1 %v2475_v14 }
0x207c   :  { %2010 = vmatprep.subr.bf16.mxu1 %v2184_v1 }
0x2136   :  { %v1298_v42 = vpop.f32.mrf.mxu1 }
0x2137   :  { %v1304_v43 = vadd.f32 %v1298_v42, %v881_v41 }
0x2138   :  { %v1984_v44 = vpop.f32.mrf.mxu1 }
0x2139   :  { %2160 = vtanh.f32 %v1304_v43  ;;  %v1759_v9 = vmul.f32 -1.442695, %v1304_v43 }
0x213a   :  { %v1301_v45 = vpop.f32.mrf.mxu1 }
0x213b   :  { %2162 = vpow2.f32 %v1759_v9  ;;  %v2050_v45 = vld [vmem:[%s2681_s9 + $0x8] sm:$0xff]   ;;  %v2053_v9 = vld [vmem:[%s2682_s11 + $0x10] sm:$0xff]  }
0x213c   :  { %v1985_v36 = vpop.f32.mrf.mxu1 }
0x213d   :  { %v2051_v36 = vld [vmem:[%s2681_s9] sm:$0xff]  }
0x2146   :  { %v2161_v46 = vpop.eup %2160 }
0x2147   :  { %1314 = vrot.lane.b32.xlu1 %v2161_v46, %s2187_s22  ;;  %v2052_v46 = vld [vmem:[%s2682_s11 + $0x18] sm:$0xff]  }
0x2148   :  { %v2163_v18 = vpop.eup %2162 }
0x2149   :  { %v1308_v47 = vadd.f32 1.0, %v2163_v18  ;;  %v1764_v18 = vld [vmem:[%s2683_s8] ss:$0 sm:$0xff] }
0x214b   :  { %2164 = vrcp.f32 %v1308_v47 }
0x2158   :  { %v2165_v14 = vpop.eup %2164 }
0x2159   :  { %v1312_v31 = vmul.f32 %v2165_v14, %v1250_v32 }
0x21b9   :  { %v1315_v48 = vpop.permute.xlu1 %1314 }
0x21ba   :  { %v1317_v49 = vmul.f32 %v2165_v14, %v1315_v48 }
0x21bc   :  { %1319 = vrot.lane.b32.xlu0 %v1317_v49, %s2187_s22 }
0x222e   :  { %v1320_v51 = vpop.permute.xlu0 %1319 }
0x222f   :  { %v1322_v52 = vadd.f32 %v1320_v51, %v1312_v31 }
0x2231   :  { %2166 = vtanh.f32 %v1322_v52 }
0x223e   :  { %v2167_v2 = vpop.eup %2166 }
0x223f   :  { %1325 = vrot.lane.b32.xlu1 %v2167_v2, %s2187_s22  ;;  %v2054_v2 = vld [vmem:[%s2682_s11 + $0x8] sm:$0xff]  }
0x22b1   :  { %v1326_v53 = vpop.permute.xlu1 %1325 }
0x22b2   :  { %v1328_v54 = vmul.f32 %v2165_v14, %v1326_v53  ;;  %v2055_v53 = vld [vmem:[%s2682_s11] sm:$0xff]  }
0x22b4   :  { %v1329_v55 = vpack.c.bf16 %v1328_v54, %v1328_v54  ;;  %v1768_v54 = vld [vmem:[%s2684_s10] ss:$0 sm:$0xff] }
0x22b6   :  { %1331 = vrot.lane.b32.xlu0 %v1329_v55, %s2188_s3 }
0x2328   :  { %v1332_v56 = vpop.permute.xlu0 %1331 }
0x2329   :  { %1991 = vmatmul.mubr.msk.bf16.vlgmr.msra.gmra.mxu0 %vm163_vm3, %v1332_v56 }
0x232a   :  { %2006 = vmatprep.mubr.msk.bf16.mxu0 %vm2185_vm1, %v2184_v1  ;;  %2003 = vmatpush3.bf16.msra.mxu0 %v2046_v34 }
0x232b   :  { %2004 = vmatprep.subr.bf16.mxu0 %v2184_v1 }
0x232e   :  { %2005 = vmatpush3.bf16.msra.mxu0 %v2047_v35 }
0x232f   :  { %2022 = vmatprep.subr.bf16.mxu0 %v2184_v1 }
0x23e9   :  { %v1370_v28 = vpop.f32.mrf.mxu0 }
0x23ea   :  { %v1376_v58 = vadd.f32 %v1370_v28, %v886_v33 }
0x23eb   :  { %v1992_v60 = vpop.f32.mrf.mxu0 }
0x23ec   :  { %2168 = vtanh.f32 %v1376_v58  ;;  %v1761_v0 = vmul.f32 -1.442695, %v1376_v58 }
0x23ed   :  { %v1373_v61 = vpop.f32.mrf.mxu0 }
0x23ee   :  { %2170 = vpow2.f32 %v1761_v0 }
0x23ef   :  { %v1993_v17 = vpop.f32.mrf.mxu0 }
0x23f9   :  { %v2169_v63 = vpop.eup %2168 }
0x23fa   :  { %1386 = vrot.lane.b32.xlu1 %v2169_v63, %s2187_s22 }
0x23fb   :  { %v2171_v59 = vpop.eup %2170 }
0x23fc   :  { %v1380_v7 = vadd.f32 1.0, %v2171_v59 }
0x23fe   :  { %2172 = vrcp.f32 %v1380_v7 }
0x240b   :  { %v2173_v57 = vpop.eup %2172 }
0x240c   :  { %v1384_v29 = vmul.f32 %v2173_v57, %v1322_v52 }
0x246c   :  { %v1387_v62 = vpop.permute.xlu1 %1386 }
0x246d   :  { %v1389_v50 = vmul.f32 %v2173_v57, %v1387_v62 }
0x246f   :  { %1391 = vrot.lane.b32.xlu0 %v1389_v50, %s2187_s22 }
0x24e1   :  { %v1392_v8 = vpop.permute.xlu0 %1391 }
0x24e2   :  { %v1394_v4 = vadd.f32 %v1392_v8, %v1384_v29 }
0x24e4   :  { %2174 = vtanh.f32 %v1394_v4 }
0x24f1   :  { %v2175_v15 = vpop.eup %2174 }
0x24f2   :  { %1397 = vrot.lane.b32.xlu1 %v2175_v15, %s2187_s22 }
0x2564   :  { %v1398_v16 = vpop.permute.xlu1 %1397 }
0x2565   :  { %v1400_v19 = vmul.f32 %v2173_v57, %v1398_v16 }
0x2567   :  { %v1401_v20 = vpack.c.bf16 %v1400_v19, %v1400_v19 }
0x2569   :  { %1403 = vrot.lane.b32.xlu0 %v1401_v20, %s2188_s3 }
0x25db   :  { %v1404_v21 = vpop.permute.xlu0 %1403 }
0x25dc   :  { %1999 = vmatmul.mubr.msk.bf16.vlgmr.msra.gmra.mxu1 %vm163_vm3, %v1404_v21 }
0x25dd   :  { %2018 = vmatprep.mubr.msk.bf16.mxu1 %vm2185_vm1, %v2184_v1  ;;  %2011 = vmatpush3.bf16.msra.mxu1 %v2048_v39 }
0x25de   :  { %2012 = vmatprep.subr.bf16.mxu1 %v2184_v1 }
0x25e1   :  { %2013 = vmatpush3.bf16.msra.mxu1 %v2049_v40 }
0x25e2   :  { %2014 = vmatprep.subr.bf16.mxu1 %v2184_v1 }
0x25e5   :  { %2015 = vmatpush3.bf16.msra.mxu1 %v2050_v45 }
0x25e6   :  { %2016 = vmatprep.subr.bf16.mxu1 %v2184_v1 }
0x25e9   :  { %2017 = vmatpush3.bf16.msra.mxu1 %v2051_v36 }
0x269c   :  { %v1442_v22 = vpop.f32.mrf.mxu1 }
0x269d   :  { %v1448_v12 = vadd.f32 %v1442_v22, %v889_v11 }
0x269e   :  { %v2000_v24 = vpop.f32.mrf.mxu1 }
0x269f   :  { %2176 = vtanh.f32 %v1448_v12  ;;  %v1763_v13 = vmul.f32 -1.442695, %v1448_v12 }
0x26a0   :  { %v1445_v25 = vpop.f32.mrf.mxu1 }
0x26a1   :  { %2178 = vpow2.f32 %v1763_v13 }
0x26a2   :  { %v2001_v3 = vpop.f32.mrf.mxu1 }
0x26ac   :  { %v2177_v26 = vpop.eup %2176 }
0x26ad   :  { %1458 = vrot.lane.b32.xlu1 %v2177_v26, %s2187_s22 }
0x26ae   :  { %v2179_v37 = vpop.eup %2178 }
0x26af   :  { %v1452_v5 = vadd.f32 1.0, %v2179_v37 }
0x26b1   :  { %2180 = vrcp.f32 %v1452_v5 }
0x26be   :  { %v2181_v27 = vpop.eup %2180 }
0x26bf   :  { %v1456_v23 = vmul.f32 %v2181_v27, %v1394_v4 }
0x271f   :  { %v1459_v10 = vpop.permute.xlu1 %1458 }
0x2720   :  { %v1461_v30 = vmul.f32 %v2181_v27, %v1459_v10 }
0x2722   :  { %1463 = vrot.lane.b32.xlu0 %v1461_v30, %s2187_s22 }
0x2794   :  { %v1464_v6 = vpop.permute.xlu0 %1463 }
0x2795   :  { %v1466_v32 = vadd.f32 %v1464_v6, %v1456_v23 }
0x2797   :  { %2182 = vtanh.f32 %v1466_v32 }
0x27a4   :  { %v2183_v38 = vpop.eup %2182 }
0x27a5   :  { %1469 = vrot.lane.b32.xlu1 %v2183_v38, %s2187_s22 }
0x2817   :  { %v1470_v41 = vpop.permute.xlu1 %1469 }
0x2818   :  { %v1472_v42 = vmul.f32 %v2181_v27, %v1470_v41 }
0x281a   :  { %v1473_v43 = vpack.c.bf16 %v1472_v42, %v1472_v42 }
0x281c   :  { %1486 = vrot.lane.b32.xlu0 %v1473_v43, %s2188_s3 }
0x288e   :  { %v1487_v44 = vpop.permute.xlu0 %1486 }
0x288f   :  { %2007 = vmatmul.mubr.msk.bf16.vlgmr.msra.gmra.mxu0 %vm163_vm3, %v1487_v44 }
0x2890   :  { %2030 = vmatprep.mubr.msk.bf16.mxu0 %vm2185_vm1, %v2184_v1  ;;  %2023 = vmatpush3.bf16.msra.mxu0 %v2052_v46 }
0x2891   :  { %2024 = vmatprep.subr.bf16.mxu0 %v2184_v1 }
0x2894   :  { %2025 = vmatpush3.bf16.msra.mxu0 %v2053_v9 }
0x2895   :  { %2026 = vmatprep.subr.bf16.mxu0 %v2184_v1 }
0x2898   :  { %2027 = vmatpush3.bf16.msra.mxu0 %v2054_v2 }
0x2899   :  { %2028 = vmatprep.subr.bf16.mxu0 %v2184_v1  ;;  %v1774_v1 = vld [vmem:[%s2685_s12] ss:$0 sm:$0xff] }
0x289c   :  { %2029 = vmatpush3.bf16.msra.mxu0 %v2055_v53 }
0x294f   :  { %v1537_v47 = vpop.f32.mrf.mxu0 }
0x2950   :  { %v1538_v14 = vadd.f32 %v1764_v18, %v1537_v47 }
0x2951   :  { %v2008_v48 = vpop.f32.mrf.mxu0 }
0x2952   :  { %v1543_v49 = vmax.f32 %v1538_v14, 0.0 }
0x2953   :  { %v1540_v31 = vpop.f32.mrf.mxu0 }
0x2954   :  { %v1544_v51 = vpack.c.bf16 %v1543_v49, %v1543_v49 }
0x2955   :  { %v2009_v52 = vpop.f32.mrf.mxu0 }
0x2956   :  { %2019 = vmatmul.mubr.msk.bf16.vlgmr.msra.gmra.mxu1 %vm1584_vm4, %v1544_v51 }
0x2a16   :  { %v1622_v55 = vpop.f32.mrf.mxu1 }
0x2a17   :  { %v1623_v56 = vadd.f32 %v1768_v54, %v1622_v55 }
0x2a18   :  { %v2020_v33 = vpop.f32.mrf.mxu1 }
0x2a19   :  { %v1628_v28 = vmax.f32 %v1623_v56, 0.0 }
0x2a1a   :  { %v1625_v58 = vpop.f32.mrf.mxu1 }
0x2a1b   :  { %v1629_v60 = vpack.c.bf16 %v1628_v28, %v1628_v28 }
0x2a1c   :  { %v2021_v61 = vpop.f32.mrf.mxu1 }
0x2a1d   :  { %2031 = vmatmul.mubr.msk.bf16.vlgmr.msra.gmra.mxu0 %vm1584_vm4, %v1629_v60 }
0x2add   :  { %v1706_v17 = vpop.f32.mrf.mxu0 }
0x2ade   :  { %v1707_v63 = vadd.f32 %v1774_v1, %v1706_v17 }
0x2adf   :  { %v2032_v0 = vpop.f32.mrf.mxu0 }
0x2ae0   :  { %1713 = vst.msk [vmem:[%s2686_s13] sm:$0xff] %vm1712_vm5, %v1707_v63 }
0x2ae1   :  { %v1709_v59 = vpop.f32.mrf.mxu0 }
0x2ae3   :  { %v2033_v7 = vpop.f32.mrf.mxu0 }

</bundles_post_ra>
